<compile_context>
chip_gen: v7x
topology: tpu7x:2x2x1
jax: 0.10.0
libtpu: 0.0.40
codegen_flags: <defaults>
</compile_context>

<pallas_src>
import jax
import jax.numpy as jnp
from jax.experimental import pallas as pl
from jax.experimental.pallas import tpu as pltpu


def _round_up(x, m):
    return ((x + m - 1) // m) * m


def _pick_tb(T, cap=16):
    """Largest divisor of T that is <= cap (keeps the xw/out blocks small)."""
    tb = min(T, cap)
    while T % tb:
        tb -= 1
    return tb


def _make_kernel(Tb, Hp):
    def kernel(xw_ref, h0_ref, w_hid_ref, w_o2o_ref, b_oo_ref,
               out_ref, hfin_ref, h_scr):
        t = pl.program_id(0)

        @pl.when(t == 0)
        def _():
            h_scr[...] = h0_ref[...]

        h = h_scr[...]                       # [Bp, Hp] VMEM-resident carry

        # Static (fully unrolled) inner time loop over the Tb steps of this block.
        for i in range(Tb):
            # xw_ref[i] already holds x_t @ W_in + category @ W_cat + b_io,
            # so the only serial work is the recurrent dot.
            io = xw_ref[i] + jnp.dot(h, w_hid_ref[...],
                                     preferred_element_type=jnp.float32)
            h = io[:, :Hp]                   # new hidden (padded lanes stay 0)

            # Fused o2o: io lanes are [hidden | out1]; one K=(Hp+Op) matmul.
            o = jnp.dot(io, w_o2o_ref[...],
                        preferred_element_type=jnp.float32) + b_oo_ref[...]

            # TODO(synk): nn.Dropout(0.1) is identity in eval mode; training-mode
            # masking (pltpu.prng_random_bits) intentionally omitted.

            # Numerically-stable log-softmax over lanes; padded lanes already at
            # -1e30 via the bias so no per-step masking is needed.
            m = jnp.max(o, axis=-1, keepdims=True)
            lse = jnp.log(jnp.sum(jnp.exp(o - m), axis=-1, keepdims=True)) + m
            out_ref[i] = o - lse

        h_scr[...] = h                       # carry to the next grid step

        @pl.when(t == pl.num_programs(0) - 1)
        def _():
            hfin_ref[...] = h                # write the resident output once

    return kernel


def rnn_forward(category, inputs, hidden0, params):
    """Fused sequence forward.

    category: [B, n_cat] (constant over the sequence, as in the PyTorch loop)
    inputs:   [T, B, input_size]
    hidden0:  [B, H]
    Returns (log_probs [T, B, O], final_hidden [B, H]).
    """
    T, B, input_size = inputs.shape
    n_cat = category.shape[1]
    H = params["w_i2h"].shape[1]
    O = params["w_i2o"].shape[1]
    Cin = n_cat + input_size                   # rows multiplying (category, input)

    Bp = _round_up(max(B, 8), 8)
    Hp = _round_up(H, 128)
    Op = _round_up(O, 128)
    Tb = _pick_tb(T)

    hi = jax.lax.Precision.HIGHEST

    def pad2(a, r, c):
        return jnp.pad(a, ((0, r - a.shape[0]), (0, c - a.shape[1])))

    # ---- pack & zero-pad parameters (weights stored [in, out]) ----
    # rows [0:Cin] of w_i2h/w_i2o multiply cat(category, input); rows [Cin:] multiply hidden.
    w_in = jnp.concatenate(
        [pad2(params["w_i2h"][:Cin], Cin, Hp), pad2(params["w_i2o"][:Cin], Cin, Op)],
        axis=1)                                                 # [Cin, Hp+Op]
    w_hid = jnp.concatenate(
        [pad2(params["w_i2h"][Cin:], Hp, Hp), pad2(params["w_i2o"][Cin:], Hp, Op)],
        axis=1)                                                 # [Hp, Hp+Op]
    b_io = jnp.concatenate(
        [pad2(params["b_i2h"], 1, Hp), pad2(params["b_i2o"], 1, Op)], axis=1)  # [1, Hp+Op]

    # Fused o2o weight: row order [hidden rows ; output rows] matches io's lane order.
    w_o2o = jnp.concatenate(
        [pad2(params["w_o2o"][:H], Hp, Op), pad2(params["w_o2o"][H:], Op, Op)],
        axis=0)                                                 # [Hp+Op, Op]
    # Bake the padded-lane logit mask into the bias: padded weight columns give 0,
    # so a -1e30 bias lane yields masked logits (no iota/where in the kernel).
    lane = jnp.arange(Op)
    b_oo = jnp.where(lane[None, :] < O, pad2(params["b_o2o"], 1, Op), -1e30)   # [1, Op]

    # ---- precompute the non-recurrent input projection for ALL steps ----
    # (single batched matmul; category contribution computed once, not replicated)
    cat_proj = jnp.dot(category, w_in[:n_cat], precision=hi)            # [B, Hp+Op]
    inp_proj = jnp.einsum("tbi,io->tbo", inputs, w_in[n_cat:], precision=hi)
    xw = inp_proj + (cat_proj + b_io)[None]                             # [T, B, Hp+Op]
    xw = jnp.pad(xw, ((0, 0), (0, Bp - B), (0, 0)))                     # [T, Bp, Hp+Op]
    h0 = jnp.pad(hidden0, ((0, Bp - B), (0, Hp - H)))                   # [Bp, Hp]

    kernel = _make_kernel(Tb, Hp)
    # Resident blocks (constant index_map): DMA'd once, stay in VMEM all sequence.
    resident = lambda shp: pl.BlockSpec(shp, lambda t, _s=len(shp): (0,) * _s)

    out, hfin = pl.pallas_call(
        kernel,
        out_shape=(
            jax.ShapeDtypeStruct((T, Bp, Op), jnp.float32),
            jax.ShapeDtypeStruct((Bp, Hp), jnp.float32),
        ),
        grid=(T // Tb,),
        in_specs=[
            pl.BlockSpec((Tb, Bp, Hp + Op), lambda t: (t, 0, 0)),   # xw (Tb-step tile)
            resident((Bp, Hp)),                                     # h0
            resident((Hp, Hp + Op)),                                # fused i2h‖i2o (hidden rows)
            resident((Hp + Op, Op)),                                # fused o2o
            resident((1, Op)),                                      # o2o bias (+mask)
        ],
        out_specs=(
            pl.BlockSpec((Tb, Bp, Op), lambda t: (t, 0, 0)),        # per-step log-probs
            resident((Bp, Hp)),                                     # final hidden
        ),
        scratch_shapes=[pltpu.VMEM((Bp, Hp), jnp.float32)],         # hidden carry
        compiler_params=pltpu.CompilerParams(
            dimension_semantics=("arbitrary",)),                    # time axis is serial
    )(xw, h0, w_hid, w_o2o, b_oo)

    return out[:, :B, :O], hfin[:B, :H]


def init_params(key, n_categories, input_size, hidden_size, output_size):
    """PyTorch-Linear-like uniform init; weights stored as [in, out]."""
    C = n_categories + input_size + hidden_size
    ks = jax.random.split(key, 6)

    def linear(kw, kb, fan_in, fan_out):
        bound = 1.0 / jnp.sqrt(jnp.float32(fan_in))
        w = jax.random.uniform(kw, (fan_in, fan_out), jnp.float32, -bound, bound)
        b = jax.random.uniform(kb, (1, fan_out), jnp.float32, -bound, bound)
        return w, b

    w_i2h, b_i2h = linear(ks[0], ks[1], C, hidden_size)
    w_i2o, b_i2o = linear(ks[2], ks[3], C, output_size)
    w_o2o, b_o2o = linear(ks[4], ks[5], hidden_size + output_size, output_size)
    return {"w_i2h": w_i2h, "b_i2h": b_i2h,
            "w_i2o": w_i2o, "b_i2o": b_i2o,
            "w_o2o": w_o2o, "b_o2o": b_o2o}


def reference_forward(category, inputs, hidden0, params):
    """Pure-JAX reference: the PyTorch forward applied step-by-step (eval-mode dropout)."""
    hi = jax.lax.Precision.HIGHEST

    def step(h, x_t):
        x = jnp.concatenate([category, x_t, h], axis=1)
        hid = jnp.dot(x, params["w_i2h"], precision=hi) + params["b_i2h"]
        out = jnp.dot(x, params["w_i2o"], precision=hi) + params["b_i2o"]
        comb = jnp.concatenate([hid, out], axis=1)
        out = jnp.dot(comb, params["w_o2o"], precision=hi) + params["b_o2o"]
        out = jax.nn.log_softmax(out, axis=1)
        return hid, out

    h = hidden0
    outs = []
    for t in range(inputs.shape[0]):
        h, o = step(h, inputs[t])
        outs.append(o)
    return jnp.stack(outs, axis=0), h


if __name__ == "__main__":
    batch = 2
    seq_len = 8
    n_categories = 4
    input_size = 16
    hidden_size = 32
    output_size = 16

    key = jax.random.PRNGKey(0)
    kp, kc, ki = jax.random.split(key, 3)

    params = init_params(kp, n_categories, input_size, hidden_size, output_size)

    cat_idx = jax.random.randint(kc, (batch,), 0, n_categories)
    category = jax.nn.one_hot(cat_idx, n_categories, dtype=jnp.float32)
    inputs = jax.random.normal(ki, (seq_len, batch, input_size), jnp.float32)
    hidden0 = jnp.zeros((batch, hidden_size), jnp.float32)

    out, hfin = jax.jit(rnn_forward)(category, inputs, hidden0, params)
    out = jax.block_until_ready(out)
    hfin = jax.block_until_ready(hfin)

    ref_out, ref_h = reference_forward(category, inputs, hidden0, params)

    assert out.shape == (seq_len, batch, output_size)
    assert hfin.shape == (batch, hidden_size)
    assert jnp.allclose(out, ref_out, atol=5e-4, rtol=5e-4), \
        float(jnp.max(jnp.abs(out - ref_out)))
    assert jnp.allclose(hfin, ref_h, atol=5e-4, rtol=5e-4), \
        float(jnp.max(jnp.abs(hfin - ref_h)))

    print("KERNEL_OK")
</pallas_src>

<mosaic_0001>
module attributes {stable_mosaic.version = 11 : i64} {
  func.func @kernel(%arg0: i32, %arg1: memref<8x8x256xf32, #tpu.memory_space<vmem>>, %arg2: memref<8x128xf32, #tpu.memory_space<vmem>>, %arg3: memref<128x256xf32, #tpu.memory_space<vmem>>, %arg4: memref<256x128xf32, #tpu.memory_space<vmem>>, %arg5: memref<1x128xf32, #tpu.memory_space<vmem>>, %arg6: memref<8x8x128xf32, #tpu.memory_space<vmem>>, %arg7: memref<8x128xf32, #tpu.memory_space<vmem>>, %arg8: memref<8x128xf32, #tpu.memory_space<vmem>>) attributes {dimension_semantics = [#tpu.dimension_semantics<arbitrary>], iteration_bounds = array<i64: 1>, scalar_prefetch = 0 : i64, scratch_operands = 1 : i64, tpu.core_type = #tpu.core_type<tc>, window_params = [{transform_indices = @transform_0, window_bounds = array<i64: 8, 8, 256>}, {pipeline_mode = #tpu.pipeline_mode<synchronous>, transform_indices = @transform_1, window_bounds = array<i64: 8, 128>}, {pipeline_mode = #tpu.pipeline_mode<synchronous>, transform_indices = @transform_2, window_bounds = array<i64: 128, 256>}, {pipeline_mode = #tpu.pipeline_mode<synchronous>, transform_indices = @transform_3, window_bounds = array<i64: 256, 128>}, {pipeline_mode = #tpu.pipeline_mode<synchronous>, transform_indices = @transform_4, window_bounds = array<i64: 1, 128>}, {transform_indices = @transform_5, window_bounds = array<i64: 8, 8, 128>}, {pipeline_mode = #tpu.pipeline_mode<synchronous>, transform_indices = @transform_6, window_bounds = array<i64: 8, 128>}]} {
    %c0_i32 = arith.constant 0 : i32
    %0 = arith.cmpi eq, %arg0, %c0_i32 : i32
    %1 = arith.extui %0 : i1 to i32
    %c0_i32_0 = arith.constant 0 : i32
    %2 = arith.cmpi ne, %1, %c0_i32_0 : i32
    scf.if %2 {
      %c0_126 = arith.constant 0 : index
      %c0_127 = arith.constant 0 : index
      %208 = vector.load %arg2[%c0_126, %c0_127] : memref<8x128xf32, #tpu.memory_space<vmem>>, vector<8x128xf32>
      %c0_128 = arith.constant 0 : index
      %c0_129 = arith.constant 0 : index
      %209 = vector.load %arg8[%c0_128, %c0_129] : memref<8x128xf32, #tpu.memory_space<vmem>>, vector<8x128xf32>
      tpu.vector_store %arg8[%c0_128, %c0_129], %208 {strides = array<i32>} : memref<8x128xf32, #tpu.memory_space<vmem>>, vector<8x128xf32>,
    } else {
    }
    %c0 = arith.constant 0 : index
    %c0_1 = arith.constant 0 : index
    %3 = vector.load %arg8[%c0, %c0_1] : memref<8x128xf32, #tpu.memory_space<vmem>>, vector<8x128xf32>
    %c0_2 = arith.constant 0 : index
    %c0_3 = arith.constant 0 : index
    %c0_4 = arith.constant 0 : index
    %4 = vector.load %arg1[%c0_2, %c0_3, %c0_4] : memref<8x8x256xf32, #tpu.memory_space<vmem>>, vector<1x8x256xf32>
    %5 = vector.shape_cast %4 : vector<1x8x256xf32> to vector<8x256xf32>
    %c0_5 = arith.constant 0 : index
    %c0_6 = arith.constant 0 : index
    %6 = vector.load %arg3[%c0_5, %c0_6] : memref<128x256xf32, #tpu.memory_space<vmem>>, vector<128x256xf32>
    %cst = arith.constant dense<0.000000e+00> : vector<8x256xf32>
    %7 = tpu.matmul %3, %6, %cst {dimension_numbers = #tpu.dot_dimension_numbers<[1], [0], [0], [1], [0, 0, 1, 1], [], []>} : vector<8x128xf32>, vector<128x256xf32>, vector<8x256xf32> -> vector<8x256xf32>
    %8 = arith.addf %5, %7 : vector<8x256xf32>
    %9 = vector.extract_strided_slice %8 {offsets = [0, 0], sizes = [8, 128], strides = [1, 1]} : vector<8x256xf32> to vector<8x128xf32>
    %c0_7 = arith.constant 0 : index
    %c0_8 = arith.constant 0 : index
    %10 = vector.load %arg4[%c0_7, %c0_8] : memref<256x128xf32, #tpu.memory_space<vmem>>, vector<256x128xf32>
    %cst_9 = arith.constant dense<0.000000e+00> : vector<8x128xf32>
    %11 = tpu.matmul %8, %10, %cst_9 {dimension_numbers = #tpu.dot_dimension_numbers<[1], [0], [0], [1], [0, 0, 1, 1], [], []>} : vector<8x256xf32>, vector<256x128xf32>, vector<8x128xf32> -> vector<8x128xf32>
    %c0_10 = arith.constant 0 : index
    %c0_11 = arith.constant 0 : index
    %12 = vector.load %arg5[%c0_10, %c0_11] : memref<1x128xf32, #tpu.memory_space<vmem>>, vector<1x128xf32>
    %13 = vector.broadcast %12 : vector<1x128xf32> to vector<8x128xf32>
    %14 = arith.addf %11, %13 : vector<8x128xf32>
    %cst_12 = arith.constant dense<0xFF800000> : vector<8xf32>
    %15 = vector.multi_reduction <maximumf>, %14, %cst_12 [1] : vector<8x128xf32> to vector<8xf32>
    %16 = vector.shape_cast %15 : vector<8xf32> to vector<8x1xf32>
    %17 = vector.broadcast %16 : vector<8x1xf32> to vector<8x128xf32>
    %18 = arith.subf %14, %17 : vector<8x128xf32>
    %19 = math.exp %18 : vector<8x128xf32>
    %cst_13 = arith.constant dense<0.000000e+00> : vector<8xf32>
    %20 = vector.multi_reduction <add>, %19, %cst_13 [1] : vector<8x128xf32> to vector<8xf32>
    %21 = vector.shape_cast %20 : vector<8xf32> to vector<8x1xf32>
    %22 = math.log %21 : vector<8x1xf32>
    %23 = arith.addf %22, %16 : vector<8x1xf32>
    %24 = vector.broadcast %23 : vector<8x1xf32> to vector<8x128xf32>
    %25 = arith.subf %14, %24 : vector<8x128xf32>
    %c0_14 = arith.constant 0 : index
    %c0_15 = arith.constant 0 : index
    %c0_16 = arith.constant 0 : index
    %26 = vector.load %arg6[%c0_14, %c0_15, %c0_16] : memref<8x8x128xf32, #tpu.memory_space<vmem>>, vector<1x8x128xf32>
    %27 = vector.shape_cast %26 : vector<1x8x128xf32> to vector<8x128xf32>
    %28 = vector.shape_cast %25 : vector<8x128xf32> to vector<1x8x128xf32>
    tpu.vector_store %arg6[%c0_14, %c0_15, %c0_16], %28 {strides = array<i32>} : memref<8x8x128xf32, #tpu.memory_space<vmem>>, vector<1x8x128xf32>,
    %c1 = arith.constant 1 : index
    %c0_17 = arith.constant 0 : index
    %c0_18 = arith.constant 0 : index
    %29 = vector.load %arg1[%c1, %c0_17, %c0_18] : memref<8x8x256xf32, #tpu.memory_space<vmem>>, vector<1x8x256xf32>
    %30 = vector.shape_cast %29 : vector<1x8x256xf32> to vector<8x256xf32>
    %c0_19 = arith.constant 0 : index
    %c0_20 = arith.constant 0 : index
    %31 = vector.load %arg3[%c0_19, %c0_20] : memref<128x256xf32, #tpu.memory_space<vmem>>, vector<128x256xf32>
    %cst_21 = arith.constant dense<0.000000e+00> : vector<8x256xf32>
    %32 = tpu.matmul %9, %31, %cst_21 {dimension_numbers = #tpu.dot_dimension_numbers<[1], [0], [0], [1], [0, 0, 1, 1], [], []>} : vector<8x128xf32>, vector<128x256xf32>, vector<8x256xf32> -> vector<8x256xf32>
    %33 = arith.addf %30, %32 : vector<8x256xf32>
    %34 = vector.extract_strided_slice %33 {offsets = [0, 0], sizes = [8, 128], strides = [1, 1]} : vector<8x256xf32> to vector<8x128xf32>
    %c0_22 = arith.constant 0 : index
    %c0_23 = arith.constant 0 : index
    %35 = vector.load %arg4[%c0_22, %c0_23] : memref<256x128xf32, #tpu.memory_space<vmem>>, vector<256x128xf32>
    %cst_24 = arith.constant dense<0.000000e+00> : vector<8x128xf32>
    %36 = tpu.matmul %33, %35, %cst_24 {dimension_numbers = #tpu.dot_dimension_numbers<[1], [0], [0], [1], [0, 0, 1, 1], [], []>} : vector<8x256xf32>, vector<256x128xf32>, vector<8x128xf32> -> vector<8x128xf32>
    %c0_25 = arith.constant 0 : index
    %c0_26 = arith.constant 0 : index
    %37 = vector.load %arg5[%c0_25, %c0_26] : memref<1x128xf32, #tpu.memory_space<vmem>>, vector<1x128xf32>
    %38 = vector.broadcast %37 : vector<1x128xf32> to vector<8x128xf32>
    %39 = arith.addf %36, %38 : vector<8x128xf32>
    %cst_27 = arith.constant dense<0xFF800000> : vector<8xf32>
    %40 = vector.multi_reduction <maximumf>, %39, %cst_27 [1] : vector<8x128xf32> to vector<8xf32>
    %41 = vector.shape_cast %40 : vector<8xf32> to vector<8x1xf32>
    %42 = vector.broadcast %41 : vector<8x1xf32> to vector<8x128xf32>
    %43 = arith.subf %39, %42 : vector<8x128xf32>
    %44 = math.exp %43 : vector<8x128xf32>
    %cst_28 = arith.constant dense<0.000000e+00> : vector<8xf32>
    %45 = vector.multi_reduction <add>, %44, %cst_28 [1] : vector<8x128xf32> to vector<8xf32>
    %46 = vector.shape_cast %45 : vector<8xf32> to vector<8x1xf32>
    %47 = math.log %46 : vector<8x1xf32>
    %48 = arith.addf %47, %41 : vector<8x1xf32>
    %49 = vector.broadcast %48 : vector<8x1xf32> to vector<8x128xf32>
    %50 = arith.subf %39, %49 : vector<8x128xf32>
    %c1_29 = arith.constant 1 : index
    %c0_30 = arith.constant 0 : index
    %c0_31 = arith.constant 0 : index
    %51 = vector.load %arg6[%c1_29, %c0_30, %c0_31] : memref<8x8x128xf32, #tpu.memory_space<vmem>>, vector<1x8x128xf32>
    %52 = vector.shape_cast %51 : vector<1x8x128xf32> to vector<8x128xf32>
    %53 = vector.shape_cast %50 : vector<8x128xf32> to vector<1x8x128xf32>
    tpu.vector_store %arg6[%c1_29, %c0_30, %c0_31], %53 {strides = array<i32>} : memref<8x8x128xf32, #tpu.memory_space<vmem>>, vector<1x8x128xf32>,
    %c2 = arith.constant 2 : index
    %c0_32 = arith.constant 0 : index
    %c0_33 = arith.constant 0 : index
    %54 = vector.load %arg1[%c2, %c0_32, %c0_33] : memref<8x8x256xf32, #tpu.memory_space<vmem>>, vector<1x8x256xf32>
    %55 = vector.shape_cast %54 : vector<1x8x256xf32> to vector<8x256xf32>
    %c0_34 = arith.constant 0 : index
    %c0_35 = arith.constant 0 : index
    %56 = vector.load %arg3[%c0_34, %c0_35] : memref<128x256xf32, #tpu.memory_space<vmem>>, vector<128x256xf32>
    %cst_36 = arith.constant dense<0.000000e+00> : vector<8x256xf32>
    %57 = tpu.matmul %34, %56, %cst_36 {dimension_numbers = #tpu.dot_dimension_numbers<[1], [0], [0], [1], [0, 0, 1, 1], [], []>} : vector<8x128xf32>, vector<128x256xf32>, vector<8x256xf32> -> vector<8x256xf32>
    %58 = arith.addf %55, %57 : vector<8x256xf32>
    %59 = vector.extract_strided_slice %58 {offsets = [0, 0], sizes = [8, 128], strides = [1, 1]} : vector<8x256xf32> to vector<8x128xf32>
    %c0_37 = arith.constant 0 : index
    %c0_38 = arith.constant 0 : index
    %60 = vector.load %arg4[%c0_37, %c0_38] : memref<256x128xf32, #tpu.memory_space<vmem>>, vector<256x128xf32>
    %cst_39 = arith.constant dense<0.000000e+00> : vector<8x128xf32>
    %61 = tpu.matmul %58, %60, %cst_39 {dimension_numbers = #tpu.dot_dimension_numbers<[1], [0], [0], [1], [0, 0, 1, 1], [], []>} : vector<8x256xf32>, vector<256x128xf32>, vector<8x128xf32> -> vector<8x128xf32>
    %c0_40 = arith.constant 0 : index
    %c0_41 = arith.constant 0 : index
    %62 = vector.load %arg5[%c0_40, %c0_41] : memref<1x128xf32, #tpu.memory_space<vmem>>, vector<1x128xf32>
    %63 = vector.broadcast %62 : vector<1x128xf32> to vector<8x128xf32>
    %64 = arith.addf %61, %63 : vector<8x128xf32>
    %cst_42 = arith.constant dense<0xFF800000> : vector<8xf32>
    %65 = vector.multi_reduction <maximumf>, %64, %cst_42 [1] : vector<8x128xf32> to vector<8xf32>
    %66 = vector.shape_cast %65 : vector<8xf32> to vector<8x1xf32>
    %67 = vector.broadcast %66 : vector<8x1xf32> to vector<8x128xf32>
    %68 = arith.subf %64, %67 : vector<8x128xf32>
    %69 = math.exp %68 : vector<8x128xf32>
    %cst_43 = arith.constant dense<0.000000e+00> : vector<8xf32>
    %70 = vector.multi_reduction <add>, %69, %cst_43 [1] : vector<8x128xf32> to vector<8xf32>
    %71 = vector.shape_cast %70 : vector<8xf32> to vector<8x1xf32>
    %72 = math.log %71 : vector<8x1xf32>
    %73 = arith.addf %72, %66 : vector<8x1xf32>
    %74 = vector.broadcast %73 : vector<8x1xf32> to vector<8x128xf32>
    %75 = arith.subf %64, %74 : vector<8x128xf32>
    %c2_44 = arith.constant 2 : index
    %c0_45 = arith.constant 0 : index
    %c0_46 = arith.constant 0 : index
    %76 = vector.load %arg6[%c2_44, %c0_45, %c0_46] : memref<8x8x128xf32, #tpu.memory_space<vmem>>, vector<1x8x128xf32>
    %77 = vector.shape_cast %76 : vector<1x8x128xf32> to vector<8x128xf32>
    %78 = vector.shape_cast %75 : vector<8x128xf32> to vector<1x8x128xf32>
    tpu.vector_store %arg6[%c2_44, %c0_45, %c0_46], %78 {strides = array<i32>} : memref<8x8x128xf32, #tpu.memory_space<vmem>>, vector<1x8x128xf32>,
    %c3 = arith.constant 3 : index
    %c0_47 = arith.constant 0 : index
    %c0_48 = arith.constant 0 : index
    %79 = vector.load %arg1[%c3, %c0_47, %c0_48] : memref<8x8x256xf32, #tpu.memory_space<vmem>>, vector<1x8x256xf32>
    %80 = vector.shape_cast %79 : vector<1x8x256xf32> to vector<8x256xf32>
    %c0_49 = arith.constant 0 : index
    %c0_50 = arith.constant 0 : index
    %81 = vector.load %arg3[%c0_49, %c0_50] : memref<128x256xf32, #tpu.memory_space<vmem>>, vector<128x256xf32>
    %cst_51 = arith.constant dense<0.000000e+00> : vector<8x256xf32>
    %82 = tpu.matmul %59, %81, %cst_51 {dimension_numbers = #tpu.dot_dimension_numbers<[1], [0], [0], [1], [0, 0, 1, 1], [], []>} : vector<8x128xf32>, vector<128x256xf32>, vector<8x256xf32> -> vector<8x256xf32>
    %83 = arith.addf %80, %82 : vector<8x256xf32>
    %84 = vector.extract_strided_slice %83 {offsets = [0, 0], sizes = [8, 128], strides = [1, 1]} : vector<8x256xf32> to vector<8x128xf32>
    %c0_52 = arith.constant 0 : index
    %c0_53 = arith.constant 0 : index
    %85 = vector.load %arg4[%c0_52, %c0_53] : memref<256x128xf32, #tpu.memory_space<vmem>>, vector<256x128xf32>
    %cst_54 = arith.constant dense<0.000000e+00> : vector<8x128xf32>
    %86 = tpu.matmul %83, %85, %cst_54 {dimension_numbers = #tpu.dot_dimension_numbers<[1], [0], [0], [1], [0, 0, 1, 1], [], []>} : vector<8x256xf32>, vector<256x128xf32>, vector<8x128xf32> -> vector<8x128xf32>
    %c0_55 = arith.constant 0 : index
    %c0_56 = arith.constant 0 : index
    %87 = vector.load %arg5[%c0_55, %c0_56] : memref<1x128xf32, #tpu.memory_space<vmem>>, vector<1x128xf32>
    %88 = vector.broadcast %87 : vector<1x128xf32> to vector<8x128xf32>
    %89 = arith.addf %86, %88 : vector<8x128xf32>
    %cst_57 = arith.constant dense<0xFF800000> : vector<8xf32>
    %90 = vector.multi_reduction <maximumf>, %89, %cst_57 [1] : vector<8x128xf32> to vector<8xf32>
    %91 = vector.shape_cast %90 : vector<8xf32> to vector<8x1xf32>
    %92 = vector.broadcast %91 : vector<8x1xf32> to vector<8x128xf32>
    %93 = arith.subf %89, %92 : vector<8x128xf32>
    %94 = math.exp %93 : vector<8x128xf32>
    %cst_58 = arith.constant dense<0.000000e+00> : vector<8xf32>
    %95 = vector.multi_reduction <add>, %94, %cst_58 [1] : vector<8x128xf32> to vector<8xf32>
    %96 = vector.shape_cast %95 : vector<8xf32> to vector<8x1xf32>
    %97 = math.log %96 : vector<8x1xf32>
    %98 = arith.addf %97, %91 : vector<8x1xf32>
    %99 = vector.broadcast %98 : vector<8x1xf32> to vector<8x128xf32>
    %100 = arith.subf %89, %99 : vector<8x128xf32>
    %c3_59 = arith.constant 3 : index
    %c0_60 = arith.constant 0 : index
    %c0_61 = arith.constant 0 : index
    %101 = vector.load %arg6[%c3_59, %c0_60, %c0_61] : memref<8x8x128xf32, #tpu.memory_space<vmem>>, vector<1x8x128xf32>
    %102 = vector.shape_cast %101 : vector<1x8x128xf32> to vector<8x128xf32>
    %103 = vector.shape_cast %100 : vector<8x128xf32> to vector<1x8x128xf32>
    tpu.vector_store %arg6[%c3_59, %c0_60, %c0_61], %103 {strides = array<i32>} : memref<8x8x128xf32, #tpu.memory_space<vmem>>, vector<1x8x128xf32>,
    %c4 = arith.constant 4 : index
    %c0_62 = arith.constant 0 : index
    %c0_63 = arith.constant 0 : index
    %104 = vector.load %arg1[%c4, %c0_62, %c0_63] : memref<8x8x256xf32, #tpu.memory_space<vmem>>, vector<1x8x256xf32>
    %105 = vector.shape_cast %104 : vector<1x8x256xf32> to vector<8x256xf32>
    %c0_64 = arith.constant 0 : index
    %c0_65 = arith.constant 0 : index
    %106 = vector.load %arg3[%c0_64, %c0_65] : memref<128x256xf32, #tpu.memory_space<vmem>>, vector<128x256xf32>
    %cst_66 = arith.constant dense<0.000000e+00> : vector<8x256xf32>
    %107 = tpu.matmul %84, %106, %cst_66 {dimension_numbers = #tpu.dot_dimension_numbers<[1], [0], [0], [1], [0, 0, 1, 1], [], []>} : vector<8x128xf32>, vector<128x256xf32>, vector<8x256xf32> -> vector<8x256xf32>
    %108 = arith.addf %105, %107 : vector<8x256xf32>
    %109 = vector.extract_strided_slice %108 {offsets = [0, 0], sizes = [8, 128], strides = [1, 1]} : vector<8x256xf32> to vector<8x128xf32>
    %c0_67 = arith.constant 0 : index
    %c0_68 = arith.constant 0 : index
    %110 = vector.load %arg4[%c0_67, %c0_68] : memref<256x128xf32, #tpu.memory_space<vmem>>, vector<256x128xf32>
    %cst_69 = arith.constant dense<0.000000e+00> : vector<8x128xf32>
    %111 = tpu.matmul %108, %110, %cst_69 {dimension_numbers = #tpu.dot_dimension_numbers<[1], [0], [0], [1], [0, 0, 1, 1], [], []>} : vector<8x256xf32>, vector<256x128xf32>, vector<8x128xf32> -> vector<8x128xf32>
    %c0_70 = arith.constant 0 : index
    %c0_71 = arith.constant 0 : index
    %112 = vector.load %arg5[%c0_70, %c0_71] : memref<1x128xf32, #tpu.memory_space<vmem>>, vector<1x128xf32>
    %113 = vector.broadcast %112 : vector<1x128xf32> to vector<8x128xf32>
    %114 = arith.addf %111, %113 : vector<8x128xf32>
    %cst_72 = arith.constant dense<0xFF800000> : vector<8xf32>
    %115 = vector.multi_reduction <maximumf>, %114, %cst_72 [1] : vector<8x128xf32> to vector<8xf32>
    %116 = vector.shape_cast %115 : vector<8xf32> to vector<8x1xf32>
    %117 = vector.broadcast %116 : vector<8x1xf32> to vector<8x128xf32>
    %118 = arith.subf %114, %117 : vector<8x128xf32>
    %119 = math.exp %118 : vector<8x128xf32>
    %cst_73 = arith.constant dense<0.000000e+00> : vector<8xf32>
    %120 = vector.multi_reduction <add>, %119, %cst_73 [1] : vector<8x128xf32> to vector<8xf32>
    %121 = vector.shape_cast %120 : vector<8xf32> to vector<8x1xf32>
    %122 = math.log %121 : vector<8x1xf32>
    %123 = arith.addf %122, %116 : vector<8x1xf32>
    %124 = vector.broadcast %123 : vector<8x1xf32> to vector<8x128xf32>
    %125 = arith.subf %114, %124 : vector<8x128xf32>
    %c4_74 = arith.constant 4 : index
    %c0_75 = arith.constant 0 : index
    %c0_76 = arith.constant 0 : index
    %126 = vector.load %arg6[%c4_74, %c0_75, %c0_76] : memref<8x8x128xf32, #tpu.memory_space<vmem>>, vector<1x8x128xf32>
    %127 = vector.shape_cast %126 : vector<1x8x128xf32> to vector<8x128xf32>
    %128 = vector.shape_cast %125 : vector<8x128xf32> to vector<1x8x128xf32>
    tpu.vector_store %arg6[%c4_74, %c0_75, %c0_76], %128 {strides = array<i32>} : memref<8x8x128xf32, #tpu.memory_space<vmem>>, vector<1x8x128xf32>,
    %c5 = arith.constant 5 : index
    %c0_77 = arith.constant 0 : index
    %c0_78 = arith.constant 0 : index
    %129 = vector.load %arg1[%c5, %c0_77, %c0_78] : memref<8x8x256xf32, #tpu.memory_space<vmem>>, vector<1x8x256xf32>
    %130 = vector.shape_cast %129 : vector<1x8x256xf32> to vector<8x256xf32>
    %c0_79 = arith.constant 0 : index
    %c0_80 = arith.constant 0 : index
    %131 = vector.load %arg3[%c0_79, %c0_80] : memref<128x256xf32, #tpu.memory_space<vmem>>, vector<128x256xf32>
    %cst_81 = arith.constant dense<0.000000e+00> : vector<8x256xf32>
    %132 = tpu.matmul %109, %131, %cst_81 {dimension_numbers = #tpu.dot_dimension_numbers<[1], [0], [0], [1], [0, 0, 1, 1], [], []>} : vector<8x128xf32>, vector<128x256xf32>, vector<8x256xf32> -> vector<8x256xf32>
    %133 = arith.addf %130, %132 : vector<8x256xf32>
    %134 = vector.extract_strided_slice %133 {offsets = [0, 0], sizes = [8, 128], strides = [1, 1]} : vector<8x256xf32> to vector<8x128xf32>
    %c0_82 = arith.constant 0 : index
    %c0_83 = arith.constant 0 : index
    %135 = vector.load %arg4[%c0_82, %c0_83] : memref<256x128xf32, #tpu.memory_space<vmem>>, vector<256x128xf32>
    %cst_84 = arith.constant dense<0.000000e+00> : vector<8x128xf32>
    %136 = tpu.matmul %133, %135, %cst_84 {dimension_numbers = #tpu.dot_dimension_numbers<[1], [0], [0], [1], [0, 0, 1, 1], [], []>} : vector<8x256xf32>, vector<256x128xf32>, vector<8x128xf32> -> vector<8x128xf32>
    %c0_85 = arith.constant 0 : index
    %c0_86 = arith.constant 0 : index
    %137 = vector.load %arg5[%c0_85, %c0_86] : memref<1x128xf32, #tpu.memory_space<vmem>>, vector<1x128xf32>
    %138 = vector.broadcast %137 : vector<1x128xf32> to vector<8x128xf32>
    %139 = arith.addf %136, %138 : vector<8x128xf32>
    %cst_87 = arith.constant dense<0xFF800000> : vector<8xf32>
    %140 = vector.multi_reduction <maximumf>, %139, %cst_87 [1] : vector<8x128xf32> to vector<8xf32>
    %141 = vector.shape_cast %140 : vector<8xf32> to vector<8x1xf32>
    %142 = vector.broadcast %141 : vector<8x1xf32> to vector<8x128xf32>
    %143 = arith.subf %139, %142 : vector<8x128xf32>
    %144 = math.exp %143 : vector<8x128xf32>
    %cst_88 = arith.constant dense<0.000000e+00> : vector<8xf32>
    %145 = vector.multi_reduction <add>, %144, %cst_88 [1] : vector<8x128xf32> to vector<8xf32>
    %146 = vector.shape_cast %145 : vector<8xf32> to vector<8x1xf32>
    %147 = math.log %146 : vector<8x1xf32>
    %148 = arith.addf %147, %141 : vector<8x1xf32>
    %149 = vector.broadcast %148 : vector<8x1xf32> to vector<8x128xf32>
    %150 = arith.subf %139, %149 : vector<8x128xf32>
    %c5_89 = arith.constant 5 : index
    %c0_90 = arith.constant 0 : index
    %c0_91 = arith.constant 0 : index
    %151 = vector.load %arg6[%c5_89, %c0_90, %c0_91] : memref<8x8x128xf32, #tpu.memory_space<vmem>>, vector<1x8x128xf32>
    %152 = vector.shape_cast %151 : vector<1x8x128xf32> to vector<8x128xf32>
    %153 = vector.shape_cast %150 : vector<8x128xf32> to vector<1x8x128xf32>
    tpu.vector_store %arg6[%c5_89, %c0_90, %c0_91], %153 {strides = array<i32>} : memref<8x8x128xf32, #tpu.memory_space<vmem>>, vector<1x8x128xf32>,
    %c6 = arith.constant 6 : index
    %c0_92 = arith.constant 0 : index
    %c0_93 = arith.constant 0 : index
    %154 = vector.load %arg1[%c6, %c0_92, %c0_93] : memref<8x8x256xf32, #tpu.memory_space<vmem>>, vector<1x8x256xf32>
    %155 = vector.shape_cast %154 : vector<1x8x256xf32> to vector<8x256xf32>
    %c0_94 = arith.constant 0 : index
    %c0_95 = arith.constant 0 : index
    %156 = vector.load %arg3[%c0_94, %c0_95] : memref<128x256xf32, #tpu.memory_space<vmem>>, vector<128x256xf32>
    %cst_96 = arith.constant dense<0.000000e+00> : vector<8x256xf32>
    %157 = tpu.matmul %134, %156, %cst_96 {dimension_numbers = #tpu.dot_dimension_numbers<[1], [0], [0], [1], [0, 0, 1, 1], [], []>} : vector<8x128xf32>, vector<128x256xf32>, vector<8x256xf32> -> vector<8x256xf32>
    %158 = arith.addf %155, %157 : vector<8x256xf32>
    %159 = vector.extract_strided_slice %158 {offsets = [0, 0], sizes = [8, 128], strides = [1, 1]} : vector<8x256xf32> to vector<8x128xf32>
    %c0_97 = arith.constant 0 : index
    %c0_98 = arith.constant 0 : index
    %160 = vector.load %arg4[%c0_97, %c0_98] : memref<256x128xf32, #tpu.memory_space<vmem>>, vector<256x128xf32>
    %cst_99 = arith.constant dense<0.000000e+00> : vector<8x128xf32>
    %161 = tpu.matmul %158, %160, %cst_99 {dimension_numbers = #tpu.dot_dimension_numbers<[1], [0], [0], [1], [0, 0, 1, 1], [], []>} : vector<8x256xf32>, vector<256x128xf32>, vector<8x128xf32> -> vector<8x128xf32>
    %c0_100 = arith.constant 0 : index
    %c0_101 = arith.constant 0 : index
    %162 = vector.load %arg5[%c0_100, %c0_101] : memref<1x128xf32, #tpu.memory_space<vmem>>, vector<1x128xf32>
    %163 = vector.broadcast %162 : vector<1x128xf32> to vector<8x128xf32>
    %164 = arith.addf %161, %163 : vector<8x128xf32>
    %cst_102 = arith.constant dense<0xFF800000> : vector<8xf32>
    %165 = vector.multi_reduction <maximumf>, %164, %cst_102 [1] : vector<8x128xf32> to vector<8xf32>
    %166 = vector.shape_cast %165 : vector<8xf32> to vector<8x1xf32>
    %167 = vector.broadcast %166 : vector<8x1xf32> to vector<8x128xf32>
    %168 = arith.subf %164, %167 : vector<8x128xf32>
    %169 = math.exp %168 : vector<8x128xf32>
    %cst_103 = arith.constant dense<0.000000e+00> : vector<8xf32>
    %170 = vector.multi_reduction <add>, %169, %cst_103 [1] : vector<8x128xf32> to vector<8xf32>
    %171 = vector.shape_cast %170 : vector<8xf32> to vector<8x1xf32>
    %172 = math.log %171 : vector<8x1xf32>
    %173 = arith.addf %172, %166 : vector<8x1xf32>
    %174 = vector.broadcast %173 : vector<8x1xf32> to vector<8x128xf32>
    %175 = arith.subf %164, %174 : vector<8x128xf32>
    %c6_104 = arith.constant 6 : index
    %c0_105 = arith.constant 0 : index
    %c0_106 = arith.constant 0 : index
    %176 = vector.load %arg6[%c6_104, %c0_105, %c0_106] : memref<8x8x128xf32, #tpu.memory_space<vmem>>, vector<1x8x128xf32>
    %177 = vector.shape_cast %176 : vector<1x8x128xf32> to vector<8x128xf32>
    %178 = vector.shape_cast %175 : vector<8x128xf32> to vector<1x8x128xf32>
    tpu.vector_store %arg6[%c6_104, %c0_105, %c0_106], %178 {strides = array<i32>} : memref<8x8x128xf32, #tpu.memory_space<vmem>>, vector<1x8x128xf32>,
    %c7 = arith.constant 7 : index
    %c0_107 = arith.constant 0 : index
    %c0_108 = arith.constant 0 : index
    %179 = vector.load %arg1[%c7, %c0_107, %c0_108] : memref<8x8x256xf32, #tpu.memory_space<vmem>>, vector<1x8x256xf32>
    %180 = vector.shape_cast %179 : vector<1x8x256xf32> to vector<8x256xf32>
    %c0_109 = arith.constant 0 : index
    %c0_110 = arith.constant 0 : index
    %181 = vector.load %arg3[%c0_109, %c0_110] : memref<128x256xf32, #tpu.memory_space<vmem>>, vector<128x256xf32>
    %cst_111 = arith.constant dense<0.000000e+00> : vector<8x256xf32>
    %182 = tpu.matmul %159, %181, %cst_111 {dimension_numbers = #tpu.dot_dimension_numbers<[1], [0], [0], [1], [0, 0, 1, 1], [], []>} : vector<8x128xf32>, vector<128x256xf32>, vector<8x256xf32> -> vector<8x256xf32>
    %183 = arith.addf %180, %182 : vector<8x256xf32>
    %184 = vector.extract_strided_slice %183 {offsets = [0, 0], sizes = [8, 128], strides = [1, 1]} : vector<8x256xf32> to vector<8x128xf32>
    %c0_112 = arith.constant 0 : index
    %c0_113 = arith.constant 0 : index
    %185 = vector.load %arg4[%c0_112, %c0_113] : memref<256x128xf32, #tpu.memory_space<vmem>>, vector<256x128xf32>
    %cst_114 = arith.constant dense<0.000000e+00> : vector<8x128xf32>
    %186 = tpu.matmul %183, %185, %cst_114 {dimension_numbers = #tpu.dot_dimension_numbers<[1], [0], [0], [1], [0, 0, 1, 1], [], []>} : vector<8x256xf32>, vector<256x128xf32>, vector<8x128xf32> -> vector<8x128xf32>
    %c0_115 = arith.constant 0 : index
    %c0_116 = arith.constant 0 : index
    %187 = vector.load %arg5[%c0_115, %c0_116] : memref<1x128xf32, #tpu.memory_space<vmem>>, vector<1x128xf32>
    %188 = vector.broadcast %187 : vector<1x128xf32> to vector<8x128xf32>
    %189 = arith.addf %186, %188 : vector<8x128xf32>
    %cst_117 = arith.constant dense<0xFF800000> : vector<8xf32>
    %190 = vector.multi_reduction <maximumf>, %189, %cst_117 [1] : vector<8x128xf32> to vector<8xf32>
    %191 = vector.shape_cast %190 : vector<8xf32> to vector<8x1xf32>
    %192 = vector.broadcast %191 : vector<8x1xf32> to vector<8x128xf32>
    %193 = arith.subf %189, %192 : vector<8x128xf32>
    %194 = math.exp %193 : vector<8x128xf32>
    %cst_118 = arith.constant dense<0.000000e+00> : vector<8xf32>
    %195 = vector.multi_reduction <add>, %194, %cst_118 [1] : vector<8x128xf32> to vector<8xf32>
    %196 = vector.shape_cast %195 : vector<8xf32> to vector<8x1xf32>
    %197 = math.log %196 : vector<8x1xf32>
    %198 = arith.addf %197, %191 : vector<8x1xf32>
    %199 = vector.broadcast %198 : vector<8x1xf32> to vector<8x128xf32>
    %200 = arith.subf %189, %199 : vector<8x128xf32>
    %c7_119 = arith.constant 7 : index
    %c0_120 = arith.constant 0 : index
    %c0_121 = arith.constant 0 : index
    %201 = vector.load %arg6[%c7_119, %c0_120, %c0_121] : memref<8x8x128xf32, #tpu.memory_space<vmem>>, vector<1x8x128xf32>
    %202 = vector.shape_cast %201 : vector<1x8x128xf32> to vector<8x128xf32>
    %203 = vector.shape_cast %200 : vector<8x128xf32> to vector<1x8x128xf32>
    tpu.vector_store %arg6[%c7_119, %c0_120, %c0_121], %203 {strides = array<i32>} : memref<8x8x128xf32, #tpu.memory_space<vmem>>, vector<1x8x128xf32>,
    %c0_122 = arith.constant 0 : index
    %c0_123 = arith.constant 0 : index
    %204 = vector.load %arg8[%c0_122, %c0_123] : memref<8x128xf32, #tpu.memory_space<vmem>>, vector<8x128xf32>
    tpu.vector_store %arg8[%c0_122, %c0_123], %184 {strides = array<i32>} : memref<8x128xf32, #tpu.memory_space<vmem>>, vector<8x128xf32>,
    %c0_i32_124 = arith.constant 0 : i32
    %205 = arith.cmpi eq, %arg0, %c0_i32_124 : i32
    %206 = arith.extui %205 : i1 to i32
    %c0_i32_125 = arith.constant 0 : i32
    %207 = arith.cmpi ne, %206, %c0_i32_125 : i32
    scf.if %207 {
      %c0_126 = arith.constant 0 : index
      %c0_127 = arith.constant 0 : index
      %208 = vector.load %arg7[%c0_126, %c0_127] : memref<8x128xf32, #tpu.memory_space<vmem>>, vector<8x128xf32>
      tpu.vector_store %arg7[%c0_126, %c0_127], %184 {strides = array<i32>} : memref<8x128xf32, #tpu.memory_space<vmem>>, vector<8x128xf32>,
    } else {
    }
    return
  }
  func.func @transform_0(%arg0: i32) -> (i32, i32, i32) {
    %c0_i32 = arith.constant 0 : i32
    %c0_i32_0 = arith.constant 0 : i32
    %c0_i32_1 = arith.constant 0 : i32
    return %arg0, %c0_i32, %c0_i32_0 : i32, i32, i32
  }
  func.func @transform_1(%arg0: i32) -> (i32, i32) {
    %c0_i32 = arith.constant 0 : i32
    %c0_i32_0 = arith.constant 0 : i32
    %c0_i32_1 = arith.constant 0 : i32
    return %c0_i32, %c0_i32_0 : i32, i32
  }
  func.func @transform_2(%arg0: i32) -> (i32, i32) {
    %c0_i32 = arith.constant 0 : i32
    %c0_i32_0 = arith.constant 0 : i32
    %c0_i32_1 = arith.constant 0 : i32
    return %c0_i32, %c0_i32_0 : i32, i32
  }
  func.func @transform_3(%arg0: i32) -> (i32, i32) {
    %c0_i32 = arith.constant 0 : i32
    %c0_i32_0 = arith.constant 0 : i32
    %c0_i32_1 = arith.constant 0 : i32
    return %c0_i32, %c0_i32_0 : i32, i32
  }
  func.func @transform_4(%arg0: i32) -> (i32, i32) {
    %c0_i32 = arith.constant 0 : i32
    %c0_i32_0 = arith.constant 0 : i32
    %c0_i32_1 = arith.constant 0 : i32
    return %c0_i32, %c0_i32_0 : i32, i32
  }
  func.func @transform_5(%arg0: i32) -> (i32, i32, i32) {
    %c0_i32 = arith.constant 0 : i32
    %c0_i32_0 = arith.constant 0 : i32
    %c0_i32_1 = arith.constant 0 : i32
    return %arg0, %c0_i32, %c0_i32_0 : i32, i32, i32
  }
  func.func @transform_6(%arg0: i32) -> (i32, i32) {
    %c0_i32 = arith.constant 0 : i32
    %c0_i32_0 = arith.constant 0 : i32
    %c0_i32_1 = arith.constant 0 : i32
    return %c0_i32, %c0_i32_0 : i32, i32
  }
}

</mosaic_0001>

<bundles_post_ra>
// kernel: rnn_forward.1
= control target key start
LH: loop header
LB: loop body
LE: loop exit
PB: predicated region body
PF: predicated region fallthrough
CT: control target
= control target key end

     0   :  { %v2734_v3 = vmov 0.0   ;;  %s3681_s2 = inlined_call_operand.vmem [shape: f32[128,256], index: 2, kind: input, shape index: {}]   ;;  %s3682_s3 = inlined_call_operand.vmem [shape: f32[256,128], index: 3, kind: input, shape index: {}]   ;;  %s3683_s1 = inlined_call_operand.vmem [shape: f32[8,128], index: 1, kind: input, shape index: {}]   ;;  %s3684_s0 = inlined_call_operand.vmem [shape: f32[8,8,256], index: 0, kind: input, shape index: {}]   ;;  %s3685_s4 = inlined_call_operand.vmem [shape: f32[1,128], index: 4, kind: input, shape index: {}]   ;;  %s3686_s6 = inlined_call_operand.vmem [shape: f32[8,128], index: 6, kind: output, shape index: {1}]   ;;  %s3687_s5 = inlined_call_operand.vmem [shape: f32[8,8,128], index: 5, kind: output, shape index: {0}]  }
   0x1   :  { %v32_v0 = vld [vmem:[%s3681_s2 + $0x8] sm:$0xff]  ;;  %v34_v1 = vld [vmem:[%s3681_s2 + $0x18] sm:$0xff]  ;;  %v31_v2 = vld [vmem:[%s3681_s2] sm:$0xff]  ;;  %127 = vmatprep.mubr.f32.mxu0 %v2734_v3 }
   0x2   :  { %v2780_v4 = vpack.c.bf16 %v34_v1, %v32_v0  ;;  %v33_v5 = vld [vmem:[%s3681_s2 + $0x10] sm:$0xff]  ;;  %v36_v6 = vld [vmem:[%s3681_s2 + $0x28] sm:$0xff]  ;;  %v38_v7 = vld [vmem:[%s3681_s2 + $0x38] sm:$0xff] }
   0x3   :  { %v2791_v8 = vpack.c.bf16 %v33_v5, %v31_v2  ;;  %v2793_v9 = vpack.c.bf16 %v38_v7, %v36_v6  ;;  %v35_v10 = vld [vmem:[%s3681_s2 + $0x20] sm:$0xff]  ;;  %v37_v11 = vld [vmem:[%s3681_s2 + $0x30] sm:$0xff]  ;;  %v40_v12 = vld [vmem:[%s3681_s2 + $0x48] sm:$0xff] }
   0x4   :  { %2190 = vmatprep.subr.bf16.mxu0 %v2780_v4  ;;  %v42_v13 = vld [vmem:[%s3681_s2 + $0x58] sm:$0xff]  ;;  %v2809_v14 = vpack.c.bf16 %v37_v11, %v35_v10  ;;  %v39_v16 = vld [vmem:[%s3681_s2 + $0x40] sm:$0xff]  ;;  %v41_v17 = vld [vmem:[%s3681_s2 + $0x50] sm:$0xff] }
   0x5   :  { %2192 = vmatpush1.bf16.msra.mxu0 %v2791_v8  ;;  %v2812_v15 = vpack.c.bf16 %v42_v13, %v40_v12  ;;  %v44_v18 = vld [vmem:[%s3681_s2 + $0x68] sm:$0xff]  ;;  %v46_v19 = vld [vmem:[%s3681_s2 + $0x78] sm:$0xff]  ;;  %v2827_v20 = vpack.c.bf16 %v41_v17, %v39_v16  ;;  %v43_v22 = vld [vmem:[%s3681_s2 + $0x60] sm:$0xff] }
   0x6   :  { %2194 = vmatprep.subr.bf16.mxu0 %v2793_v9  ;;  %v2830_v21 = vpack.c.bf16 %v46_v19, %v44_v18  ;;  %v45_v23 = vld [vmem:[%s3681_s2 + $0x70] sm:$0xff]  ;;  %v48_v24 = vld [vmem:[%s3681_s2 + $0x88] sm:$0xff]  ;;  %v50_v25 = vld [vmem:[%s3681_s2 + $0x98] sm:$0xff] }
   0x7   :  { %v47_v26 = vld [vmem:[%s3681_s2 + $0x80] sm:$0xff]  ;;  %v49_v27 = vld [vmem:[%s3681_s2 + $0x90] sm:$0xff]  ;;  %v153_v29 = vld [vmem:[%s3682_s3 + $0x88] sm:$0xff]  ;;  %v2860_v31 = vpack.c.bf16 %v45_v23, %v43_v22  ;;  %v2874_v36 = vpack.c.bf16 %v50_v25, %v48_v24 }
   0x8   :  { %v152_v28 = vld [vmem:[%s3682_s3 + $0x80] sm:$0xff]  ;;  %v137_v33 = vld [vmem:[%s3682_s3 + $0x8] sm:$0xff]  ;;  %v154_v34 = vld [vmem:[%s3682_s3 + $0x90] sm:$0xff]  ;;  %v2903_v46 = vpack.c.bf16 %v49_v27, %v47_v26 }
   0x9   :  { %2196 = vmatpush1.bf16.msra.mxu0 %v2809_v14  ;;  %v136_v30 = vld [vmem:[%s3682_s3] sm:$0xff]  ;;  %v2862_v32 = vpack.c.bf16 %v153_v29, %v152_v28  ;;  %v155_v35 = vld [vmem:[%s3682_s3 + $0x98] sm:$0xff]  ;;  %v138_v39 = vld [vmem:[%s3682_s3 + $0x10] sm:$0xff] }
   0xa   :  { %2198 = vmatprep.subr.bf16.mxu0 %v2812_v15  ;;  %v2876_v37 = vpack.c.bf16 %v137_v33, %v136_v30  ;;  %v2878_v38 = vpack.c.bf16 %v155_v35, %v154_v34  ;;  %v139_v40 = vld [vmem:[%s3682_s3 + $0x18] sm:$0xff]  ;;  %v156_v41 = vld [vmem:[%s3682_s3 + $0xa0] sm:$0xff]  ;;  %v52_v42 = vld [vmem:[%s3681_s2 + $0xa8] sm:$0xff] }
   0xb   :  { %v54_v43 = vld [vmem:[%s3681_s2 + $0xb8] sm:$0xff]  ;;  %2222 = vmatprep.subr.bf16.mxu1 %v2862_v32  ;;  %v157_v44 = vld [vmem:[%s3682_s3 + $0xa8] sm:$0xff]  ;;  %v2900_v45 = vpack.c.bf16 %v139_v40, %v138_v39  ;;  %v51_v47 = vld [vmem:[%s3681_s2 + $0xa0] sm:$0xff] }
   0xc   :  { %2224 = vmatpush3.bf16.msra.mxu1 %v2876_v37  ;;  %v2909_v48 = vpack.c.bf16 %v157_v44, %v156_v41  ;;  %v140_v49 = vld [vmem:[%s3682_s3 + $0x20] sm:$0xff]  ;;  %v141_v50 = vld [vmem:[%s3682_s3 + $0x28] sm:$0xff]  ;;  %v2918_v51 = vpack.c.bf16 %v54_v43, %v52_v42  ;;  %v53_v52 = vld [vmem:[%s3681_s2 + $0xb0] sm:$0xff] }
   0xd   :  { %2200 = vmatpush1.bf16.msra.mxu0 %v2827_v20  ;;  %2226 = vmatprep.subr.bf16.mxu1 %v2878_v38  ;;  %v158_v53 = vld [vmem:[%s3682_s3 + $0xb0] sm:$0xff]  ;;  %v159_v54 = vld [vmem:[%s3682_s3 + $0xb8] sm:$0xff]  ;;  %v56_v55 = vld [vmem:[%s3681_s2 + $0xc8] sm:$0xff]  ;;  %v2936_v57 = vpack.c.bf16 %v141_v50, %v140_v49  ;;  %v2939_v58 = vpack.c.bf16 %v53_v52, %v51_v47 }
   0xe   :  { %2202 = vmatprep.subr.bf16.mxu0 %v2830_v21  ;;  %v58_v56 = vld [vmem:[%s3681_s2 + $0xd8] sm:$0xff]  ;;  %v55_v59 = vld [vmem:[%s3681_s2 + $0xc0] sm:$0xff]  ;;  %v2945_v60 = vpack.c.bf16 %v159_v54, %v158_v53  ;;  %v142_v61 = vld [vmem:[%s3682_s3 + $0x30] sm:$0xff] }
   0xf   :  { %v143_v62 = vld [vmem:[%s3682_s3 + $0x38] sm:$0xff]  ;;  %v2954_v63 = vpack.c.bf16 %v58_v56, %v56_v55  ;;  %v57_v0 = vld [vmem:[%s3681_s2 + $0xd0] sm:$0xff]  ;;  %v160_v1 = vld [vmem:[%s3682_s3 + $0xc0] sm:$0xff] }
  0x10   :  { %2228 = vmatpush3.bf16.msra.mxu1 %v2900_v45  ;;  %v161_v2 = vld [vmem:[%s3682_s3 + $0xc8] sm:$0xff]  ;;  %v62_v6 = vld [vmem:[%s3681_s2 + $0xf8] sm:$0xff]  ;;  %v2972_v7 = vpack.c.bf16 %v143_v62, %v142_v61  ;;  %v2975_v10 = vpack.c.bf16 %v57_v0, %v55_v59  ;;  %v59_v11 = vld [vmem:[%s3681_s2 + $0xe0] sm:$0xff] }
  0x11   :  { %2204 = vmatpush1.bf16.msra.mxu0 %v2860_v31  ;;  %2230 = vmatprep.subr.bf16.mxu1 %v2909_v48  ;;  %v60_v5 = vld [vmem:[%s3681_s2 + $0xe8] sm:$0xff]  ;;  %v2981_v12 = vpack.c.bf16 %v161_v2, %v160_v1  ;;  %v144_v13 = vld [vmem:[%s3682_s3 + $0x40] sm:$0xff]  ;;  %v61_v18 = vld [vmem:[%s3681_s2 + $0xf0] sm:$0xff] }
  0x12   :  { %2206 = vmatprep.subr.bf16.mxu0 %v2874_v36  ;;  %v145_v16 = vld [vmem:[%s3682_s3 + $0x48] sm:$0xff]  ;;  %v2990_v17 = vpack.c.bf16 %v62_v6, %v60_v5  ;;  %v162_v19 = vld [vmem:[%s3682_s3 + $0xd0] sm:$0xff]  ;;  %v163_v22 = vld [vmem:[%s3682_s3 + $0xd8] sm:$0xff]  ;;  %v3005_v24 = vpack.c.bf16 %v61_v18, %v59_v11 }
  0x13   :  { %v3002_v23 = vpack.c.bf16 %v145_v16, %v144_v13  ;;  %v3008_v25 = vpack.c.bf16 %v163_v22, %v162_v19  ;;  %v146_v26 = vld [vmem:[%s3682_s3 + $0x50] sm:$0xff]  ;;  %v147_v27 = vld [vmem:[%s3682_s3 + $0x58] sm:$0xff]  ;;  %v164_v28 = vld [vmem:[%s3682_s3 + $0xe0] sm:$0xff] }
  0x14   :  { %2232 = vmatpush3.bf16.msra.mxu1 %v2936_v57  ;;  %v165_v29 = vld [vmem:[%s3682_s3 + $0xe8] sm:$0xff]  ;;  %v3024_v30 = vpack.c.bf16 %v147_v27, %v146_v26  ;;  %v26_v33 = vld [vmem:[%s3683_s1] sm:$0xff]  ;;  %v166_v41 = vld [vmem:[%s3682_s3 + $0xf0] sm:$0xff] }
  0x15   :  { %2208 = vmatpush1.bf16.msra.mxu0 %v2903_v46  ;;  %2234 = vmatprep.subr.bf16.mxu1 %v2945_v60  ;;  %v3031_v34 = vpack.c.bf16 %v165_v29, %v164_v28  ;;  %v148_v35 = vld [vmem:[%s3682_s3 + $0x60] sm:$0xff]  ;;  %v149_v39 = vld [vmem:[%s3682_s3 + $0x68] sm:$0xff]  ;;  %v167_v42 = vld [vmem:[%s3682_s3 + $0xf8] sm:$0xff] }
  0x16   :  { %2210 = vmatprep.subr.bf16.mxu0 %v2918_v51  ;;  %v3041_v40 = vpack.c.bf16 %v149_v39, %v148_v35  ;;  %v3068_v43 = vpack.c.bf16 %v167_v42, %v166_v41  ;;  %v150_v44 = vld [vmem:[%s3682_s3 + $0x70] sm:$0xff]  ;;  %v151_v47 = vld [vmem:[%s3682_s3 + $0x78] sm:$0xff]  ;;  %v29_v50 = vld [vmem:[%s3684_s0] sm:$0xff] }
  0x17   :  { %v3076_v49 = vpack.c.bf16 %v151_v47, %v150_v44  ;;  %v30_v52 = vld [vmem:[%s3684_s0 + $0x8] sm:$0xff]  ;;  %v1881_v59 = vld [vmem:[%s3684_s0 + $0x10] sm:$0xff]  ;;  %v1882_v61 = vld [vmem:[%s3684_s0 + $0x18] sm:$0xff] }
  0x18   :  { %2236 = vmatpush3.bf16.msra.mxu1 %v2972_v7  ;;  %v3129_v6 = vld [vmem:[%s3685_s4] ss:$0 sm:$0xff]  ;;  %v964_v22 = vld [vmem:[%s3681_s2 + $0x70] sm:$0xff]  ;;  %v971_v29 = vld [vmem:[%s3681_s2 + $0xa8] sm:$0xff] }
  0x19   :  { %2212 = vmatpush1.bf16.msra.mxu0 %v2939_v58  ;;  %2238 = vmatprep.subr.bf16.mxu1 %v2981_v12  ;;  %v962_v19 = vld [vmem:[%s3681_s2 + $0x60] sm:$0xff]  ;;  %v968_v28 = vld [vmem:[%s3681_s2 + $0x90] sm:$0xff]  ;;  %v977_v41 = vld [vmem:[%s3681_s2 + $0xd8] sm:$0xff] }
  0x1a   :  { %2214 = vmatprep.subr.bf16.mxu0 %v2954_v63  ;;  %v966_v27 = vld [vmem:[%s3681_s2 + $0x80] sm:$0xff]  ;;  %v972_v39 = vld [vmem:[%s3681_s2 + $0xb0] sm:$0xff] }
  0x1b   :  { %v970_v35 = vld [vmem:[%s3681_s2 + $0xa0] sm:$0xff]  ;;  %v976_v47 = vld [vmem:[%s3681_s2 + $0xd0] sm:$0xff] }
  0x1c   :  { %2240 = vmatpush3.bf16.msra.mxu1 %v3002_v23  ;;  %v3287_v42 = vpack.c.bf16 %v972_v39, %v970_v35  ;;  %v974_v44 = vld [vmem:[%s3681_s2 + $0xc0] sm:$0xff]  ;;  %v1061_v39 = vld [vmem:[%s3682_s3 + $0x30] sm:$0xff] }
  0x1d   :  { %2216 = vmatpush1.bf16.msra.mxu0 %v2975_v10  ;;  %2242 = vmatprep.subr.bf16.mxu1 %v3008_v25 }
  0x1e   :  { %2218 = vmatprep.subr.bf16.mxu0 %v2990_v17 }
  0x20   :  { %2244 = vmatpush3.bf16.msra.mxu1 %v3024_v30 }
  0x21   :  { %2220 = vmatpush1.bf16.msra.mxu0 %v3005_v24  ;;  %2246 = vmatprep.subr.bf16.mxu1 %v3031_v34 }
  0x22   :  { %2254 = vmatprep.subr.bf16.mxu0 %v2780_v4 }
  0x24   :  { %128 = vmatmul.mubr.f32.vlgmr.msra.gmra.mrb[0].mxu0 %v26_v33  ;;  %2248 = vmatpush3.bf16.msra.mxu1 %v3041_v40  ;;  %v3269_v33 = vpack.c.bf16 %v968_v28, %v966_v27  ;;  %v1060_v27 = vld [vmem:[%s3682_s3 + $0x28] sm:$0xff]  ;;  %v1077_v28 = vld [vmem:[%s3682_s3 + $0xb0] sm:$0xff] }
  0x25   :  { %2256 = vmatpush1.bf16.msra.mxu0 %v2791_v8  ;;  %356 = vmatprep.mubr.f32.mxu0 %v2734_v3 }
  0x26   :  { %2258 = vmatprep.subr.bf16.mxu0 %v2793_v9  ;;  %2250 = vmatprep.subr.bf16.mxu1 %v3068_v43 }
  0x28   :  { %2252 = vmatpush3.bf16.msra.mxu1 %v3076_v49 }
  0x29   :  { %2260 = vmatpush1.bf16.msra.mxu0 %v2809_v14  ;;  %2286 = vmatprep.subr.bf16.mxu1 %v2862_v32 }
  0x2a   :  { %2262 = vmatprep.subr.bf16.mxu0 %v2812_v15 }
  0x2d   :  { %2264 = vmatpush1.bf16.msra.mxu0 %v2827_v20 }
  0x2e   :  { %2266 = vmatprep.subr.bf16.mxu0 %v2830_v21 }
  0x31   :  { %2268 = vmatpush1.bf16.msra.mxu0 %v2860_v31 }
  0x32   :  { %2270 = vmatprep.subr.bf16.mxu0 %v2874_v36 }
  0x35   :  { %2272 = vmatpush1.bf16.msra.mxu0 %v2903_v46 }
  0x36   :  { %2274 = vmatprep.subr.bf16.mxu0 %v2918_v51 }
  0x39   :  { %2276 = vmatpush1.bf16.msra.mxu0 %v2939_v58 }
  0x3a   :  { %2278 = vmatprep.subr.bf16.mxu0 %v2954_v63 }
  0x3d   :  { %2280 = vmatpush1.bf16.msra.mxu0 %v2975_v10 }
  0x3e   :  { %2282 = vmatprep.subr.bf16.mxu0 %v2990_v17 }
  0x41   :  { %2284 = vmatpush1.bf16.msra.mxu0 %v3005_v24 }
  0x42   :  { %2318 = vmatprep.subr.bf16.mxu0 %v2780_v4 }
  0xf7   :  { %v129_v53 = vpop.f32.mrb[0].mxu0 }
  0xf8   :  { %v134_v54 = vadd.f32 %v129_v53, %v29_v50  ;;  %v131_v55 = vpop.f32.mrb[1].mxu0  ;;  %v981_v50 = vld [vmem:[%s3681_s2 + $0xf8] sm:$0xff] }
  0xf9   :  { %v135_v56 = vadd.f32 %v131_v55, %v30_v52  ;;  %v3305_v52 = vpack.c.bf16 %v976_v47, %v974_v44  ;;  %v980_v55 = vld [vmem:[%s3681_s2 + $0xf0] sm:$0xff]  ;;  %v1080_v44 = vld [vmem:[%s3682_s3 + $0xc8] sm:$0xff] }
  0xfa   :  { %357 = vmatmul.mubr.f32.vlgmr.msra.gmra.mrb[2].mxu0 %v134_v54 }
  0xfb   :  { %239 = vmatprep.mubr.f32.mxu1 %v135_v56  ;;  %2320 = vmatpush1.bf16.msra.mxu0 %v2791_v8 }
  0xfc   :  { %240 = vmatmul.mubr.f32.vlgmr.msra.gmra.mrb[0].mxu1 %v134_v54  ;;  %2322 = vmatprep.subr.bf16.mxu0 %v2793_v9  ;;  %v978_v54 = vld [vmem:[%s3681_s2 + $0xe0] sm:$0xff] }
  0xfd   :  { %2288 = vmatpush3.bf16.msra.mxu1 %v2876_v37  ;;  %586 = vmatprep.mubr.f32.mxu0 %v2734_v3  ;;  %v3318_v56 = vpack.c.bf16 %v980_v55, %v978_v54  ;;  %v1064_v54 = vld [vmem:[%s3682_s3 + $0x48] sm:$0xff]  ;;  %v1081_v55 = vld [vmem:[%s3682_s3 + $0xd0] sm:$0xff] }
  0xfe   :  { %2290 = vmatprep.subr.bf16.mxu1 %v2878_v38 }
  0xff   :  { %2324 = vmatpush1.bf16.msra.mxu0 %v2809_v14 }
 0x100   :  { %2326 = vmatprep.subr.bf16.mxu0 %v2812_v15 }
 0x101   :  { %2292 = vmatpush3.bf16.msra.mxu1 %v2900_v45 }
 0x102   :  { %2294 = vmatprep.subr.bf16.mxu1 %v2909_v48 }
 0x103   :  { %2328 = vmatpush1.bf16.msra.mxu0 %v2827_v20 }
 0x104   :  { %2330 = vmatprep.subr.bf16.mxu0 %v2830_v21 }
 0x105   :  { %2296 = vmatpush3.bf16.msra.mxu1 %v2936_v57 }
 0x106   :  { %2298 = vmatprep.subr.bf16.mxu1 %v2945_v60 }
 0x107   :  { %2332 = vmatpush1.bf16.msra.mxu0 %v2860_v31 }
 0x108   :  { %2334 = vmatprep.subr.bf16.mxu0 %v2874_v36 }
 0x109   :  { %2300 = vmatpush3.bf16.msra.mxu1 %v2972_v7 }
 0x10a   :  { %2302 = vmatprep.subr.bf16.mxu1 %v2981_v12 }
 0x10b   :  { %2336 = vmatpush1.bf16.msra.mxu0 %v2903_v46 }
 0x10c   :  { %2338 = vmatprep.subr.bf16.mxu0 %v2918_v51 }
 0x10d   :  { %2304 = vmatpush3.bf16.msra.mxu1 %v3002_v23 }
 0x10e   :  { %2306 = vmatprep.subr.bf16.mxu1 %v3008_v25 }
 0x10f   :  { %2340 = vmatpush1.bf16.msra.mxu0 %v2939_v58 }
 0x110   :  { %2342 = vmatprep.subr.bf16.mxu0 %v2954_v63 }
 0x111   :  { %2308 = vmatpush3.bf16.msra.mxu1 %v3024_v30 }
 0x112   :  { %2310 = vmatprep.subr.bf16.mxu1 %v3031_v34 }
 0x113   :  { %2344 = vmatpush1.bf16.msra.mxu0 %v2975_v10 }
 0x114   :  { %2346 = vmatprep.subr.bf16.mxu0 %v2990_v17 }
 0x115   :  { %2312 = vmatpush3.bf16.msra.mxu1 %v3041_v40 }
 0x116   :  { %2314 = vmatprep.subr.bf16.mxu1 %v3068_v43 }
 0x117   :  { %2348 = vmatpush1.bf16.msra.mxu0 %v3005_v24 }
 0x118   :  { %2382 = vmatprep.subr.bf16.mxu0 %v2780_v4 }
 0x119   :  { %2316 = vmatpush3.bf16.msra.mxu1 %v3076_v49 }
 0x11a   :  { %2350 = vmatprep.subr.bf16.mxu1 %v2862_v32 }
 0x1cd   :  { %v358_v62 = vpop.f32.mrb[2].mxu0 }
 0x1ce   :  { %v363_v0 = vadd.f32 %v1881_v59, %v358_v62  ;;  %v360_v1 = vpop.f32.mrb[3].mxu0  ;;  %v1889_v59 = vld [vmem:[%s3684_s0 + $0x30] sm:$0xff] }
 0x1cf   :  { %v364_v2 = vadd.f32 %v1882_v61, %v360_v1  ;;  %v1941_v5 = vpop.f32.mrb[0].mxu1  ;;  %v1890_v61 = vld [vmem:[%s3684_s0 + $0x38] sm:$0xff] }
 0x1d0   :  { %v1942_v11 = vpop.f32.mrb[1].mxu1  ;;  %587 = vmatmul.mubr.f32.vlgmr.msra.gmra.mrb[4].mxu0 %v363_v0 }
 0x1d1   :  { %v1943_v13 = vadd.f32 %v1942_v11, %v1941_v5  ;;  %468 = vmatprep.mubr.f32.mxu1 %v364_v2  ;;  %2384 = vmatpush1.bf16.msra.mxu0 %v2791_v8 }
 0x1d2   :  { %469 = vmatmul.mubr.f32.vlgmr.msra.gmra.mrb[2].mxu1 %v363_v0  ;;  %2386 = vmatprep.subr.bf16.mxu0 %v2793_v9  ;;  %v1885_v9 = vld [vmem:[%s3684_s0 + $0x20] sm:$0xff] }
 0x1d3   :  { %v3134_v16 = vadd.f32 %v1943_v13, %v3129_v6  ;;  %2352 = vmatpush3.bf16.msra.mxu1 %v2876_v37  ;;  %816 = vmatprep.mubr.f32.mxu0 %v2734_v3 }
 0x1d4   :  { %2354 = vmatprep.subr.bf16.mxu1 %v2878_v38 }
 0x1d5   :  { %245 = vmax.xlane.f32.xlu0 %v3134_v16  ;;  %2388 = vmatpush1.bf16.msra.mxu0 %v2809_v14  ;;  %v1886_v14 = vld [vmem:[%s3684_s0 + $0x28] sm:$0xff] }
 0x1d6   :  { %2390 = vmatprep.subr.bf16.mxu0 %v2812_v15 }
 0x1d7   :  { %2356 = vmatpush3.bf16.msra.mxu1 %v2900_v45 }
 0x1d8   :  { %2358 = vmatprep.subr.bf16.mxu1 %v2909_v48 }
 0x1d9   :  { %2392 = vmatpush1.bf16.msra.mxu0 %v2827_v20 }
 0x1da   :  { %2394 = vmatprep.subr.bf16.mxu0 %v2830_v21 }
 0x1db   :  { %2360 = vmatpush3.bf16.msra.mxu1 %v2936_v57 }
 0x1dc   :  { %2362 = vmatprep.subr.bf16.mxu1 %v2945_v60 }
 0x1dd   :  { %2396 = vmatpush1.bf16.msra.mxu0 %v2860_v31 }
 0x1de   :  { %2398 = vmatprep.subr.bf16.mxu0 %v2874_v36 }
 0x1df   :  { %2364 = vmatpush3.bf16.msra.mxu1 %v2972_v7 }
 0x1e0   :  { %2366 = vmatprep.subr.bf16.mxu1 %v2981_v12 }
 0x1e1   :  { %2400 = vmatpush1.bf16.msra.mxu0 %v2903_v46 }
 0x1e2   :  { %2402 = vmatprep.subr.bf16.mxu0 %v2918_v51  ;;  %v959_v51 = vld [vmem:[%s3681_s2 + $0x48] sm:$0xff] }
 0x1e3   :  { %2368 = vmatpush3.bf16.msra.mxu1 %v3002_v23 }
 0x1e4   :  { %2370 = vmatprep.subr.bf16.mxu1 %v3008_v25 }
 0x1e5   :  { %2404 = vmatpush1.bf16.msra.mxu0 %v2939_v58 }
 0x1e6   :  { %2406 = vmatprep.subr.bf16.mxu0 %v2954_v63  ;;  %v958_v63 = vld [vmem:[%s3681_s2 + $0x40] sm:$0xff] }
 0x1e7   :  { %2372 = vmatpush3.bf16.msra.mxu1 %v3024_v30 }
 0x1e8   :  { %2374 = vmatprep.subr.bf16.mxu1 %v3031_v34 }
 0x1e9   :  { %2408 = vmatpush1.bf16.msra.mxu0 %v2975_v10  ;;  %v963_v10 = vld [vmem:[%s3681_s2 + $0x68] sm:$0xff] }
 0x1ea   :  { %2410 = vmatprep.subr.bf16.mxu0 %v2990_v17 }
 0x1eb   :  { %2376 = vmatpush3.bf16.msra.mxu1 %v3041_v40 }
 0x1ec   :  { %2378 = vmatprep.subr.bf16.mxu1 %v3068_v43 }
 0x1ed   :  { %2412 = vmatpush1.bf16.msra.mxu0 %v3005_v24  ;;  %v969_v24 = vld [vmem:[%s3681_s2 + $0x98] sm:$0xff] }
 0x1ee   :  { %2446 = vmatprep.subr.bf16.mxu0 %v2780_v4 }
 0x1ef   :  { %2380 = vmatpush3.bf16.msra.mxu1 %v3076_v49 }
 0x1f0   :  { %2414 = vmatprep.subr.bf16.mxu1 %v2862_v32 }
 0x2a3   :  { %v588_v15 = vpop.f32.mrb[4].mxu0 }
 0x2a4   :  { %v593_v20 = vadd.f32 %v1885_v9, %v588_v15  ;;  %v590_v21 = vpop.f32.mrb[5].mxu0  ;;  %v1183_v15 = vld [vmem:[%s3681_s2 + $0x18] sm:$0xff] }
 0x2a5   :  { %v594_v31 = vadd.f32 %v1886_v14, %v590_v21  ;;  %v1976_v36 = vpop.f32.mrb[2].mxu1  ;;  %v1181_v14 = vld [vmem:[%s3681_s2 + $0x8] sm:$0xff] }
 0x2a6   :  { %v1977_v46 = vpop.f32.mrb[3].mxu1  ;;  %817 = vmatmul.mubr.f32.vlgmr.msra.gmra.mrb[6].mxu0 %v593_v20  ;;  %v3341_v21 = vpack.c.bf16 %v1183_v15, %v1181_v14  ;;  %v1067_v14 = vld [vmem:[%s3682_s3 + $0x60] sm:$0xff]  ;;  %v1068_v15 = vld [vmem:[%s3682_s3 + $0x68] sm:$0xff] }
 0x2a7   :  { %v1978_v4 = vadd.f32 %v1977_v46, %v1976_v36  ;;  %698 = vmatprep.mubr.f32.mxu1 %v594_v31  ;;  %2448 = vmatpush1.bf16.msra.mxu0 %v2791_v8  ;;  %v955_v8 = vld [vmem:[%s3681_s2 + $0x28] sm:$0xff]  ;;  %v1182_v31 = vld [vmem:[%s3681_s2 + $0x10] sm:$0xff]  ;;  %v1071_v36 = vld [vmem:[%s3682_s3 + $0x80] sm:$0xff] }
 0x2a8   :  { %699 = vmatmul.mubr.f32.vlgmr.msra.gmra.mrb[4].mxu1 %v593_v20  ;;  %1046 = vmatprep.mubr.f32.mxu0 %v2734_v3  ;;  %v1180_v20 = vld [vmem:[%s3681_s2] sm:$0xff]  ;;  %v1072_v46 = vld [vmem:[%s3682_s3 + $0x88] sm:$0xff] }
 0x2a9   :  { %v3177_v32 = vadd.f32 %v1978_v4, %v3129_v6  ;;  %2416 = vmatpush3.bf16.msra.mxu1 %v2876_v37  ;;  %v957_v37 = vld [vmem:[%s3681_s2 + $0x38] sm:$0xff]  ;;  %v3352_v4 = vpack.c.bf16 %v1182_v31, %v1180_v20  ;;  %v3483_v20 = vpack.c.bf16 %v1068_v15, %v1067_v14  ;;  %v1085_v31 = vld [vmem:[%s3682_s3 + $0xf0] sm:$0xff] }
 0x2aa   :  { %2418 = vmatprep.subr.bf16.mxu1 %v2878_v38  ;;  %v954_v38 = vld [vmem:[%s3681_s2 + $0x20] sm:$0xff] }
 0x2ab   :  { %474 = vmax.xlane.f32.xlu0 %v3177_v32 }
 0x2ad   :  { %2420 = vmatpush3.bf16.msra.mxu1 %v2900_v45  ;;  %v3200_v45 = vpack.c.bf16 %v957_v37, %v955_v8  ;;  %v3354_v8 = vpack.c.bf16 %v1072_v46, %v1071_v36  ;;  %v1055_v37 = vld [vmem:[%s3682_s3] sm:$0xff]  ;;  %v1086_v36 = vld [vmem:[%s3682_s3 + $0xf8] sm:$0xff] }
 0x2ae   :  { %2422 = vmatprep.subr.bf16.mxu1 %v2909_v48  ;;  %v956_v48 = vld [vmem:[%s3681_s2 + $0x30] sm:$0xff]  ;;  %v3497_v46 = vpack.c.bf16 %v1086_v36, %v1085_v31 }
 0x2af   :  { %v3212_v58 = vpack.c.bf16 %v956_v48, %v954_v38  ;;  %2450 = vmatprep.subr.bf16.mxu0 %v3200_v45  ;;  %v1056_v38 = vld [vmem:[%s3682_s3 + $0x8] sm:$0xff]  ;;  %v1073_v48 = vld [vmem:[%s3682_s3 + $0x90] sm:$0xff] }
 0x2b1   :  { %2424 = vmatpush3.bf16.msra.mxu1 %v2936_v57  ;;  %v961_v57 = vld [vmem:[%s3681_s2 + $0x58] sm:$0xff]  ;;  %2452 = vmatpush1.bf16.msra.mxu0 %v3212_v58 }
 0x2b2   :  { %2426 = vmatprep.subr.bf16.mxu1 %v2945_v60  ;;  %v3214_v60 = vpack.c.bf16 %v961_v57, %v959_v51  ;;  %v3366_v51 = vpack.c.bf16 %v1056_v38, %v1055_v37  ;;  %v1074_v57 = vld [vmem:[%s3682_s3 + $0x98] sm:$0xff]  ;;  %v1069_v37 = vld [vmem:[%s3682_s3 + $0x70] sm:$0xff] }
 0x2b3   :  { %v1070_v38 = vld [vmem:[%s3682_s3 + $0x78] sm:$0xff] }
 0x2b4   :  { %2454 = vmatprep.subr.bf16.mxu0 %v3214_v60 }
 0x2b5   :  { %2428 = vmatpush3.bf16.msra.mxu1 %v2972_v7  ;;  %v960_v7 = vld [vmem:[%s3681_s2 + $0x50] sm:$0xff] }
 0x2b6   :  { %2430 = vmatprep.subr.bf16.mxu1 %v2981_v12  ;;  %v965_v12 = vld [vmem:[%s3681_s2 + $0x78] sm:$0xff]  ;;  %v3230_v17 = vpack.c.bf16 %v960_v7, %v958_v63  ;;  %v1057_v63 = vld [vmem:[%s3682_s3 + $0x10] sm:$0xff] }
 0x2b7   :  { %v3234_v18 = vpack.c.bf16 %v965_v12, %v963_v10  ;;  %v1058_v7 = vld [vmem:[%s3682_s3 + $0x18] sm:$0xff]  ;;  %v3379_v10 = vpack.c.bf16 %v1074_v57, %v1073_v48  ;;  %v1075_v12 = vld [vmem:[%s3682_s3 + $0xa0] sm:$0xff]  ;;  %v3505_v48 = vpack.c.bf16 %v1070_v38, %v1069_v37 }
 0x2b8   :  { %2456 = vmatpush1.bf16.msra.mxu0 %v3230_v17  ;;  %v1893_v57 = vld [vmem:[%s3684_s0 + $0x40] sm:$0xff] }
 0x2b9   :  { %2432 = vmatpush3.bf16.msra.mxu1 %v3002_v23  ;;  %v967_v23 = vld [vmem:[%s3681_s2 + $0x88] sm:$0xff]  ;;  %2458 = vmatprep.subr.bf16.mxu0 %v3234_v18 }
 0x2ba   :  { %2434 = vmatprep.subr.bf16.mxu1 %v3008_v25  ;;  %v3250_v25 = vpack.c.bf16 %v964_v22, %v962_v19  ;;  %v3254_v26 = vpack.c.bf16 %v969_v24, %v967_v23  ;;  %v1076_v19 = vld [vmem:[%s3682_s3 + $0xa8] sm:$0xff]  ;;  %v3389_v22 = vpack.c.bf16 %v1058_v7, %v1057_v63  ;;  %v1059_v24 = vld [vmem:[%s3682_s3 + $0x20] sm:$0xff] }
 0x2bb   :  { %v3392_v23 = vpack.c.bf16 %v1076_v19, %v1075_v12  ;;  %v1894_v63 = vld [vmem:[%s3684_s0 + $0x48] sm:$0xff] }
 0x2bc   :  { %2460 = vmatpush1.bf16.msra.mxu0 %v3250_v25 }
 0x2bd   :  { %2436 = vmatpush3.bf16.msra.mxu1 %v3024_v30  ;;  %v973_v30 = vld [vmem:[%s3681_s2 + $0xb8] sm:$0xff]  ;;  %2462 = vmatprep.subr.bf16.mxu0 %v3254_v26 }
 0x2be   :  { %2438 = vmatprep.subr.bf16.mxu1 %v3031_v34  ;;  %v3272_v34 = vpack.c.bf16 %v973_v30, %v971_v29  ;;  %v1078_v29 = vld [vmem:[%s3682_s3 + $0xb8] sm:$0xff]  ;;  %v3409_v30 = vpack.c.bf16 %v1060_v27, %v1059_v24 }
 0x2bf   :  { %v3412_v35 = vpack.c.bf16 %v1078_v29, %v1077_v28 }
 0x2c0   :  { %2464 = vmatpush1.bf16.msra.mxu0 %v3269_v33 }
 0x2c1   :  { %2440 = vmatpush3.bf16.msra.mxu1 %v3041_v40  ;;  %v975_v40 = vld [vmem:[%s3681_s2 + $0xc8] sm:$0xff]  ;;  %2466 = vmatprep.subr.bf16.mxu0 %v3272_v34 }
 0x2c2   :  { %2442 = vmatprep.subr.bf16.mxu1 %v3068_v43  ;;  %v3290_v43 = vpack.c.bf16 %v977_v41, %v975_v40  ;;  %v1062_v40 = vld [vmem:[%s3682_s3 + $0x38] sm:$0xff]  ;;  %v1079_v41 = vld [vmem:[%s3682_s3 + $0xc0] sm:$0xff] }
 0x2c3   :  { %v3429_v47 = vpack.c.bf16 %v1062_v40, %v1061_v39  ;;  %v1898_v40 = vld [vmem:[%s3684_s0 + $0x58] sm:$0xff] }
 0x2c4   :  { %2468 = vmatpush1.bf16.msra.mxu0 %v3287_v42 }
 0x2c5   :  { %2444 = vmatpush3.bf16.msra.mxu1 %v3076_v49  ;;  %v979_v49 = vld [vmem:[%s3681_s2 + $0xe8] sm:$0xff]  ;;  %2470 = vmatprep.subr.bf16.mxu0 %v3290_v43 }
 0x2c6   :  { %v3308_v53 = vpack.c.bf16 %v981_v50, %v979_v49  ;;  %2478 = vmatprep.subr.bf16.mxu1 %v3354_v8  ;;  %v3432_v49 = vpack.c.bf16 %v1080_v44, %v1079_v41  ;;  %v1063_v50 = vld [vmem:[%s3682_s3 + $0x40] sm:$0xff] }
 0x2c8   :  { %2472 = vmatpush1.bf16.msra.mxu0 %v3305_v52 }
 0x2c9   :  { %2474 = vmatprep.subr.bf16.mxu0 %v3308_v53 }
 0x2cc   :  { %2476 = vmatpush1.bf16.msra.mxu0 %v3318_v56 }
 0x2cd   :  { %2510 = vmatprep.subr.bf16.mxu0 %v3341_v21 }
 0x379   :  { %v818_v62 = vpop.f32.mrb[6].mxu0 }
 0x37a   :  { %v823_v0 = vadd.f32 %v1889_v59, %v818_v62  ;;  %v820_v1 = vpop.f32.mrb[7].mxu0  ;;  %v1082_v59 = vld [vmem:[%s3682_s3 + $0xd8] sm:$0xff] }
 0x37b   :  { %v824_v2 = vadd.f32 %v1890_v61, %v820_v1  ;;  %v2011_v5 = vpop.f32.mrb[4].mxu1  ;;  %v3449_v61 = vpack.c.bf16 %v1064_v54, %v1063_v50  ;;  %v3452_v62 = vpack.c.bf16 %v1082_v59, %v1081_v55  ;;  %v1066_v1 = vld [vmem:[%s3682_s3 + $0x58] sm:$0xff] }
 0x37c   :  { %v2012_v11 = vpop.f32.mrb[5].mxu1  ;;  %1047 = vmatmul.mubr.f32.vlgmr.msra.gmra.mrb[8].mxu0 %v823_v0 }
 0x37d   :  { %v2013_v13 = vadd.f32 %v2012_v11, %v2011_v5  ;;  %928 = vmatprep.mubr.f32.mxu1 %v824_v2  ;;  %1276 = vmatprep.mubr.f32.mxu0 %v2734_v3  ;;  %v1083_v2 = vld [vmem:[%s3682_s3 + $0xe0] sm:$0xff]  ;;  %v1084_v5 = vld [vmem:[%s3682_s3 + $0xe8] sm:$0xff] }
 0x37e   :  { %929 = vmatmul.mubr.f32.vlgmr.msra.gmra.mrb[6].mxu1 %v823_v0  ;;  %2512 = vmatpush1.bf16.msra.mxu0 %v3352_v4  ;;  %v1065_v0 = vld [vmem:[%s3682_s3 + $0x50] sm:$0xff] }
 0x37f   :  { %v3329_v9 = vadd.f32 %v2013_v13, %v3129_v6  ;;  %2480 = vmatpush3.bf16.msra.mxu1 %v3366_v51  ;;  %2514 = vmatprep.subr.bf16.mxu0 %v3200_v45  ;;  %v3469_v11 = vpack.c.bf16 %v1066_v1, %v1065_v0  ;;  %v3472_v13 = vpack.c.bf16 %v1084_v5, %v1083_v2 }
 0x380   :  { %2482 = vmatprep.subr.bf16.mxu1 %v3379_v10 }
 0x381   :  { %704 = vmax.xlane.f32.xlu1 %v3329_v9 }
 0x382   :  { %2516 = vmatpush1.bf16.msra.mxu0 %v3212_v58 }
 0x383   :  { %2484 = vmatpush3.bf16.msra.mxu1 %v3389_v22  ;;  %2518 = vmatprep.subr.bf16.mxu0 %v3214_v60 }
 0x384   :  { %2486 = vmatprep.subr.bf16.mxu1 %v3392_v23 }
 0x386   :  { %2520 = vmatpush1.bf16.msra.mxu0 %v3230_v17 }
 0x387   :  { %2488 = vmatpush3.bf16.msra.mxu1 %v3409_v30  ;;  %2522 = vmatprep.subr.bf16.mxu0 %v3234_v18 }
 0x388   :  { %2490 = vmatprep.subr.bf16.mxu1 %v3412_v35 }
 0x38a   :  { %2524 = vmatpush1.bf16.msra.mxu0 %v3250_v25 }
 0x38b   :  { %2492 = vmatpush3.bf16.msra.mxu1 %v3429_v47  ;;  %2526 = vmatprep.subr.bf16.mxu0 %v3254_v26 }
 0x38c   :  { %2494 = vmatprep.subr.bf16.mxu1 %v3432_v49 }
 0x38e   :  { %2528 = vmatpush1.bf16.msra.mxu0 %v3269_v33 }
 0x38f   :  { %2496 = vmatpush3.bf16.msra.mxu1 %v3449_v61  ;;  %2530 = vmatprep.subr.bf16.mxu0 %v3272_v34 }
 0x390   :  { %2498 = vmatprep.subr.bf16.mxu1 %v3452_v62 }
 0x392   :  { %2532 = vmatpush1.bf16.msra.mxu0 %v3287_v42 }
 0x393   :  { %2500 = vmatpush3.bf16.msra.mxu1 %v3469_v11  ;;  %2534 = vmatprep.subr.bf16.mxu0 %v3290_v43 }
 0x394   :  { %2502 = vmatprep.subr.bf16.mxu1 %v3472_v13 }
 0x396   :  { %2536 = vmatpush1.bf16.msra.mxu0 %v3305_v52 }
 0x397   :  { %2504 = vmatpush3.bf16.msra.mxu1 %v3483_v20  ;;  %2538 = vmatprep.subr.bf16.mxu0 %v3308_v53 }
 0x398   :  { %2506 = vmatprep.subr.bf16.mxu1 %v3497_v46 }
 0x39a   :  { %2540 = vmatpush1.bf16.msra.mxu0 %v3318_v56 }
 0x39b   :  { %2574 = vmatprep.subr.bf16.mxu0 %v3341_v21  ;;  %2508 = vmatpush3.bf16.msra.mxu1 %v3505_v48 }
 0x39c   :  { %2542 = vmatprep.subr.bf16.mxu1 %v3354_v8 }
 0x44f   :  { %v1048_v7 = vpop.f32.mrb[8].mxu0 }
 0x450   :  { %v1053_v12 = vadd.f32 %v1893_v57, %v1048_v7  ;;  %v1050_v19 = vpop.f32.mrb[9].mxu0 }
 0x451   :  { %v1054_v24 = vadd.f32 %v1894_v63, %v1050_v19  ;;  %v2046_v27 = vpop.f32.mrb[6].mxu1 }
 0x452   :  { %v2047_v28 = vpop.f32.mrb[7].mxu1  ;;  %1277 = vmatmul.mubr.f32.vlgmr.msra.gmra.mrb[10].mxu0 %v1053_v12 }
 0x453   :  { %v2048_v29 = vadd.f32 %v2047_v28, %v2046_v27  ;;  %1158 = vmatprep.mubr.f32.mxu1 %v1054_v24  ;;  %2576 = vmatpush1.bf16.msra.mxu0 %v3352_v4 }
 0x454   :  { %1159 = vmatmul.mubr.f32.vlgmr.msra.gmra.mrb[8].mxu1 %v1053_v12  ;;  %2578 = vmatprep.subr.bf16.mxu0 %v3200_v45 }
 0x455   :  { %v3519_v39 = vadd.f32 %v2048_v29, %v3129_v6  ;;  %2544 = vmatpush3.bf16.msra.mxu1 %v3366_v51  ;;  %1506 = vmatprep.mubr.f32.mxu0 %v2734_v3  ;;  %v1897_v6 = vld [vmem:[%s3684_s0 + $0x50] sm:$0xff] }
 0x456   :  { %2546 = vmatprep.subr.bf16.mxu1 %v3379_v10 }
 0x457   :  { %934 = vmax.xlane.f32.xlu1 %v3519_v39  ;;  %2580 = vmatpush1.bf16.msra.mxu0 %v3212_v58 }
 0x458   :  { %2582 = vmatprep.subr.bf16.mxu0 %v3214_v60 }
 0x459   :  { %2548 = vmatpush3.bf16.msra.mxu1 %v3389_v22 }
 0x45a   :  { %2550 = vmatprep.subr.bf16.mxu1 %v3392_v23 }
 0x45b   :  { %2584 = vmatpush1.bf16.msra.mxu0 %v3230_v17 }
 0x45c   :  { %2586 = vmatprep.subr.bf16.mxu0 %v3234_v18 }
 0x45d   :  { %2552 = vmatpush3.bf16.msra.mxu1 %v3409_v30 }
 0x45e   :  { %2554 = vmatprep.subr.bf16.mxu1 %v3412_v35 }
 0x45f   :  { %2588 = vmatpush1.bf16.msra.mxu0 %v3250_v25 }
 0x460   :  { %2590 = vmatprep.subr.bf16.mxu0 %v3254_v26 }
 0x461   :  { %2556 = vmatpush3.bf16.msra.mxu1 %v3429_v47 }
 0x462   :  { %2558 = vmatprep.subr.bf16.mxu1 %v3432_v49 }
 0x463   :  { %2592 = vmatpush1.bf16.msra.mxu0 %v3269_v33 }
 0x464   :  { %2594 = vmatprep.subr.bf16.mxu0 %v3272_v34 }
 0x465   :  { %2560 = vmatpush3.bf16.msra.mxu1 %v3449_v61 }
 0x466   :  { %2562 = vmatprep.subr.bf16.mxu1 %v3452_v62 }
 0x467   :  { %2596 = vmatpush1.bf16.msra.mxu0 %v3287_v42 }
 0x468   :  { %2598 = vmatprep.subr.bf16.mxu0 %v3290_v43 }
 0x469   :  { %2564 = vmatpush3.bf16.msra.mxu1 %v3469_v11 }
 0x46a   :  { %2566 = vmatprep.subr.bf16.mxu1 %v3472_v13 }
 0x46b   :  { %2600 = vmatpush1.bf16.msra.mxu0 %v3305_v52 }
 0x46c   :  { %2602 = vmatprep.subr.bf16.mxu0 %v3308_v53 }
 0x46d   :  { %2568 = vmatpush3.bf16.msra.mxu1 %v3483_v20 }
 0x46e   :  { %2570 = vmatprep.subr.bf16.mxu1 %v3497_v46 }
 0x46f   :  { %2604 = vmatpush1.bf16.msra.mxu0 %v3318_v56 }
 0x470   :  { %2638 = vmatprep.subr.bf16.mxu0 %v3341_v21  ;;  %v3562_v21 = vld [vmem:[%s3685_s4] ss:$0 sm:$0xff] }
 0x471   :  { %2572 = vmatpush3.bf16.msra.mxu1 %v3505_v48 }
 0x472   :  { %2606 = vmatprep.subr.bf16.mxu1 %v3354_v8 }
 0x525   :  { %v1278_v41 = vpop.f32.mrb[10].mxu0 }
 0x526   :  { %v1283_v44 = vadd.f32 %v1897_v6, %v1278_v41  ;;  %v1280_v50 = vpop.f32.mrb[11].mxu0 }
 0x527   :  { %v1284_v54 = vadd.f32 %v1898_v40, %v1280_v50  ;;  %v2081_v55 = vpop.f32.mrb[8].mxu1 }
 0x528   :  { %v2082_v59 = vpop.f32.mrb[9].mxu1  ;;  %1507 = vmatmul.mubr.f32.vlgmr.msra.gmra.mrb[12].mxu0 %v1283_v44 }
 0x529   :  { %v2083_v0 = vadd.f32 %v2082_v59, %v2081_v55  ;;  %1388 = vmatprep.mubr.f32.mxu1 %v1284_v54  ;;  %2640 = vmatpush1.bf16.msra.mxu0 %v3352_v4 }
 0x52a   :  { %1389 = vmatmul.mubr.f32.vlgmr.msra.gmra.mrb[10].mxu1 %v1283_v44  ;;  %2642 = vmatprep.subr.bf16.mxu0 %v3200_v45  ;;  %v1902_v45 = vld [vmem:[%s3684_s0 + $0x68] sm:$0xff] }
 0x52b   :  { %v3567_v1 = vadd.f32 %v2083_v0, %v3562_v21  ;;  %2608 = vmatpush3.bf16.msra.mxu1 %v3366_v51  ;;  %1736 = vmatprep.mubr.f32.mxu0 %v2734_v3  ;;  %v1901_v3 = vld [vmem:[%s3684_s0 + $0x60] sm:$0xff] }
 0x52c   :  { %2610 = vmatprep.subr.bf16.mxu1 %v3379_v10 }
 0x52d   :  { %1164 = vmax.xlane.f32.xlu0 %v3567_v1  ;;  %2644 = vmatpush1.bf16.msra.mxu0 %v3212_v58 }
 0x52e   :  { %2646 = vmatprep.subr.bf16.mxu0 %v3214_v60 }
 0x52f   :  { %2612 = vmatpush3.bf16.msra.mxu1 %v3389_v22 }
 0x530   :  { %2614 = vmatprep.subr.bf16.mxu1 %v3392_v23 }
 0x531   :  { %2648 = vmatpush1.bf16.msra.mxu0 %v3230_v17 }
 0x532   :  { %2650 = vmatprep.subr.bf16.mxu0 %v3234_v18 }
 0x533   :  { %2616 = vmatpush3.bf16.msra.mxu1 %v3409_v30 }
 0x534   :  { %2618 = vmatprep.subr.bf16.mxu1 %v3412_v35 }
 0x535   :  { %2652 = vmatpush1.bf16.msra.mxu0 %v3250_v25 }
 0x536   :  { %2654 = vmatprep.subr.bf16.mxu0 %v3254_v26 }
 0x537   :  { %2620 = vmatpush3.bf16.msra.mxu1 %v3429_v47 }
 0x538   :  { %2622 = vmatprep.subr.bf16.mxu1 %v3432_v49 }
 0x539   :  { %2656 = vmatpush1.bf16.msra.mxu0 %v3269_v33 }
 0x53a   :  { %2658 = vmatprep.subr.bf16.mxu0 %v3272_v34 }
 0x53b   :  { %2624 = vmatpush3.bf16.msra.mxu1 %v3449_v61 }
 0x53c   :  { %2626 = vmatprep.subr.bf16.mxu1 %v3452_v62 }
 0x53d   :  { %2660 = vmatpush1.bf16.msra.mxu0 %v3287_v42  ;;  %v246_v42 = vpop.xlane.xlu0 %245 }
 0x53e   :  { %2662 = vmatprep.subr.bf16.mxu0 %v3290_v43  ;;  %v247_v43 = vsub.f32 %v3134_v16, %v246_v42 }
 0x53f   :  { %2628 = vmatpush3.bf16.msra.mxu1 %v3469_v11 }
 0x540   :  { %2630 = vmatprep.subr.bf16.mxu1 %v3472_v13 }
 0x541   :  { %2664 = vmatpush1.bf16.msra.mxu0 %v3305_v52  ;;  %v3626_v52 = vpop.xlane.xlu0 %474 }
 0x542   :  { %2666 = vmatprep.subr.bf16.mxu0 %v3308_v53  ;;  %v705_v53 = vpop.xlane.xlu1 %704 }
 0x543   :  { %2632 = vmatpush3.bf16.msra.mxu1 %v3483_v20  ;;  %v706_v4 = vsub.f32 %v3329_v9, %v705_v53 }
 0x544   :  { %2634 = vmatprep.subr.bf16.mxu1 %v3497_v46 }
 0x545   :  { %2668 = vmatpush1.bf16.msra.mxu0 %v3318_v56  ;;  %v248_v56 = vmul.f32 1.442695, %v247_v43 }
 0x546   :  { %v935_v44 = vpop.xlane.xlu1 %934 }
 0x547   :  { %2636 = vmatpush3.bf16.msra.mxu1 %v3505_v48  ;;  %2702 = vpow2.f32 %v248_v56  ;;  %v936_v54 = vsub.f32 %v3519_v39, %v935_v44 }
 0x548   :  { %2670 = vmatprep.subr.bf16.mxu1 %v3354_v8 }
 0x549   :  { %v937_v55 = vmul.f32 1.442695, %v936_v54 }
 0x5ba   :  { %v1165_v8 = vpop.xlane.xlu0 %1164 }
 0x5fb   :  { %v1508_v58 = vpop.f32.mrb[12].mxu0 }
 0x5fc   :  { %v1513_v60 = vadd.f32 %v1901_v3, %v1508_v58  ;;  %v1510_v17 = vpop.f32.mrb[13].mxu0 }
 0x5fd   :  { %v1514_v18 = vadd.f32 %v1902_v45, %v1510_v17  ;;  %v2116_v25 = vpop.f32.mrb[10].mxu1 }
 0x5fe   :  { %v2117_v26 = vpop.f32.mrb[11].mxu1  ;;  %1737 = vmatmul.mubr.f32.vlgmr.msra.gmra.mrb[14].mxu0 %v1513_v60 }
 0x5ff   :  { %v2118_v33 = vadd.f32 %v2117_v26, %v2116_v25  ;;  %1618 = vmatprep.mubr.f32.mxu1 %v1514_v18 }
 0x600   :  { %1619 = vmatmul.mubr.f32.vlgmr.msra.gmra.mrb[12].mxu1 %v1513_v60 }
 0x601   :  { %v3607_v34 = vadd.f32 %v2118_v33, %v3562_v21  ;;  %2672 = vmatpush3.bf16.msra.mxu1 %v3366_v51  ;;  %v1905_v51 = vld [vmem:[%s3684_s0 + $0x70] sm:$0xff] }
 0x602   :  { %2674 = vmatprep.subr.bf16.mxu1 %v3379_v10  ;;  %v1906_v10 = vld [vmem:[%s3684_s0 + $0x78] sm:$0xff] }
 0x603   :  { %1394 = vmax.xlane.f32.xlu1 %v3607_v34 }
 0x605   :  { %2676 = vmatpush3.bf16.msra.mxu1 %v3389_v22 }
 0x606   :  { %2678 = vmatprep.subr.bf16.mxu1 %v3392_v23  ;;  %v707_v23 = vmul.f32 1.442695, %v706_v4 }
 0x608   :  { %2704 = vpow2.f32 %v707_v23 }
 0x609   :  { %2680 = vmatpush3.bf16.msra.mxu1 %v3409_v30  ;;  %v1166_v30 = vsub.f32 %v3567_v1, %v1165_v8 }
 0x60a   :  { %2682 = vmatprep.subr.bf16.mxu1 %v3412_v35 }
 0x60b   :  { %v1167_v5 = vmul.f32 1.442695, %v1166_v30 }
 0x60d   :  { %2684 = vmatpush3.bf16.msra.mxu1 %v3429_v47  ;;  %2706 = vpow2.f32 %v1167_v5 }
 0x60e   :  { %2686 = vmatprep.subr.bf16.mxu1 %v3432_v49 }
 0x611   :  { %2688 = vmatpush3.bf16.msra.mxu1 %v3449_v61 }
 0x612   :  { %2690 = vmatprep.subr.bf16.mxu1 %v3452_v62 }
 0x615   :  { %2692 = vmatpush3.bf16.msra.mxu1 %v3469_v11 }
 0x616   :  { %2694 = vmatprep.subr.bf16.mxu1 %v3472_v13  ;;  %v2703_v13 = vpop.eup %2702 }
 0x617   :  { %v2705_v14 = vpop.eup %2704 }
 0x618   :  { %v2707_v15 = vpop.eup %2706 }
 0x619   :  { %2696 = vmatpush3.bf16.msra.mxu1 %v3483_v20 }
 0x61a   :  { %2698 = vmatprep.subr.bf16.mxu1 %v3497_v46 }
 0x61d   :  { %2700 = vmatpush3.bf16.msra.mxu1 %v3505_v48 }
 0x6d1   :  { %v1738_v22 = vpop.f32.mrb[14].mxu0 }
 0x6d2   :  { %v1743_v35 = vadd.f32 %v1905_v51, %v1738_v22  ;;  %v1740_v47 = vpop.f32.mrb[15].mxu0 }
 0x6d3   :  { %v1744_v49 = vadd.f32 %v1906_v10, %v1740_v47  ;;  %v2151_v61 = vpop.f32.mrb[12].mxu1 }
 0x6d4   :  { %1871 = vst [vmem:[%s3686_s6] sm:$0xff] %v1743_v35  ;;  %v2152_v62 = vpop.f32.mrb[13].mxu1 }
 0x6d5   :  { %v2153_v2 = vadd.f32 %v2152_v62, %v2151_v61  ;;  %1848 = vmatprep.mubr.f32.mxu1 %v1744_v49 }
 0x6d6   :  { %1849 = vmatmul.mubr.f32.vlgmr.msra.gmra.mrb[14].mxu1 %v1743_v35 }
 0x6d7   :  { %v3640_v11 = vadd.f32 %v2153_v2, %v3562_v21 }
 0x6d9   :  { %1624 = vmax.xlane.f32.xlu0 %v3640_v11 }
 0x6dd   :  { %250 = vadd.xlane.f32.xlu0 %v2703_v13 }
 0x6e1   :  { %709 = vadd.xlane.f32.xlu0 %v2705_v14 }
 0x6e5   :  { %1169 = vadd.xlane.f32.xlu0 %v2707_v15 }
 0x766   :  { %v1625_v20 = vpop.xlane.xlu0 %1624 }
 0x767   :  { %v1626_v31 = vsub.f32 %v3640_v11, %v1625_v20 }
 0x769   :  { %v1627_v36 = vmul.f32 1.442695, %v1626_v31 }
 0x76a   :  { %v251_v46 = vpop.xlane.xlu0 %250 }
 0x76b   :  { %2708 = vpow2.f32 %v1627_v36 }
 0x76c   :  { %2710 = vlog2.f32 %v251_v46 }
 0x76e   :  { %v710_v37 = vpop.xlane.xlu0 %709 }
 0x76f   :  { %2712 = vlog2.f32 %v710_v37 }
 0x772   :  { %v1170_v38 = vpop.xlane.xlu0 %1169 }
 0x773   :  { %2714 = vlog2.f32 %v1170_v38 }
 0x775   :  { %v2709_v48 = vpop.eup %2708 }
 0x776   :  { %v2711_v57 = vpop.eup %2710  ;;  %1629 = vadd.xlane.f32.xlu0 %v2709_v48 }
 0x777   :  { %v253_v63 = vmul.f32 0.6931472, %v2711_v57 }
 0x779   :  { %v2713_v7 = vpop.eup %2712  ;;  %v254_v12 = vadd.f32 %v253_v63, %v246_v42 }
 0x77a   :  { %v712_v19 = vmul.f32 0.6931472, %v2713_v7 }
 0x77b   :  { %v255_v24 = vsub.f32 %v3134_v16, %v254_v12  ;;  %v476_v16 = vsub.f32 %v3177_v32, %v3626_v52 }
 0x77c   :  { %v713_v27 = vadd.f32 %v712_v19, %v705_v53 }
 0x77d   :  { %v2715_v28 = vpop.eup %2714  ;;  %256 = vst [vmem:[%s3687_s5] sm:$0xff] %v255_v24  ;;  %v477_v50 = vmul.f32 1.442695, %v476_v16 }
 0x77e   :  { %v714_v29 = vsub.f32 %v3329_v9, %v713_v27  ;;  %v1172_v6 = vmul.f32 0.6931472, %v2715_v28  ;;  %v1395_v9 = vpop.xlane.xlu1 %1394 }
 0x77f   :  { %2716 = vpow2.f32 %v477_v50  ;;  %v1396_v59 = vsub.f32 %v3607_v34, %v1395_v9 }
 0x780   :  { %1888 = vst [vmem:[%s3687_s5 + $0x10] sm:$0xff] %v714_v29  ;;  %v1173_v40 = vadd.f32 %v1172_v6, %v1165_v8  ;;  %2718 = vpow2.f32 %v937_v55 }
 0x782   :  { %v1174_v41 = vsub.f32 %v3567_v1, %v1173_v40  ;;  %v1397_v1 = vmul.f32 1.442695, %v1396_v59 }
 0x784   :  { %1896 = vst [vmem:[%s3687_s5 + $0x20] sm:$0xff] %v1174_v41  ;;  %2720 = vpow2.f32 %v1397_v1 }
 0x789   :  { %v2717_v60 = vpop.eup %2716 }
 0x78a   :  { %v2719_v17 = vpop.eup %2718 }
 0x78e   :  { %v2721_v18 = vpop.eup %2720 }
 0x7a9   :  { %v2186_v0 = vpop.f32.mrb[14].mxu1 }
 0x7aa   :  { %v2187_v3 = vpop.f32.mrb[15].mxu1 }
 0x7ab   :  { %v2188_v45 = vadd.f32 %v2187_v3, %v2186_v0 }
 0x7ad   :  { %v1851_v58 = vadd.f32 %v2188_v45, %v3562_v21 }
 0x7af   :  { %1854 = vmax.xlane.f32.xlu1 %v1851_v58 }
 0x7b3   :  { %479 = vadd.xlane.f32.xlu1 %v2717_v60 }
 0x7b7   :  { %939 = vadd.xlane.f32.xlu1 %v2719_v17 }
 0x7bb   :  { %1399 = vadd.xlane.f32.xlu1 %v2721_v18 }
 0x803   :  { %v1630_v25 = vpop.xlane.xlu0 %1629 }
 0x804   :  { %2722 = vlog2.f32 %v1630_v25 }
 0x80e   :  { %v2723_v26 = vpop.eup %2722 }
 0x80f   :  { %v1632_v33 = vmul.f32 0.6931472, %v2723_v26 }
 0x811   :  { %v1633_v42 = vadd.f32 %v1632_v33, %v1625_v20 }
 0x813   :  { %v1634_v43 = vsub.f32 %v3640_v11, %v1633_v42 }
 0x815   :  { %1904 = vst [vmem:[%s3687_s5 + $0x30] sm:$0xff] %v1634_v43 }
 0x83c   :  { %v1855_v21 = vpop.xlane.xlu1 %1854 }
 0x83d   :  { %v1856_v53 = vsub.f32 %v1851_v58, %v1855_v21 }
 0x83f   :  { %v1857_v56 = vmul.f32 1.442695, %v1856_v53 }
 0x840   :  { %v480_v4 = vpop.xlane.xlu1 %479 }
 0x841   :  { %2724 = vpow2.f32 %v1857_v56 }
 0x842   :  { %2726 = vlog2.f32 %v480_v4 }
 0x844   :  { %v940_v8 = vpop.xlane.xlu1 %939 }
 0x845   :  { %2728 = vlog2.f32 %v940_v8 }
 0x848   :  { %v1400_v51 = vpop.xlane.xlu1 %1399 }
 0x849   :  { %2730 = vlog2.f32 %v1400_v51 }
 0x84b   :  { %v2725_v10 = vpop.eup %2724 }
 0x84c   :  { %v2727_v22 = vpop.eup %2726  ;;  %1859 = vadd.xlane.f32.xlu1 %v2725_v10 }
 0x84d   :  { %v482_v23 = vmul.f32 0.6931472, %v2727_v22 }
 0x84f   :  { %v2729_v30 = vpop.eup %2728  ;;  %v483_v35 = vadd.f32 %v482_v23, %v3626_v52 }
 0x850   :  { %v942_v47 = vmul.f32 0.6931472, %v2729_v30 }
 0x851   :  { %v484_v49 = vsub.f32 %v3177_v32, %v483_v35 }
 0x852   :  { %v943_v61 = vadd.f32 %v942_v47, %v935_v44 }
 0x853   :  { %v2731_v62 = vpop.eup %2730  ;;  %1884 = vst [vmem:[%s3687_s5 + $0x8] sm:$0xff] %v484_v49 }
 0x854   :  { %v944_v2 = vsub.f32 %v3519_v39, %v943_v61  ;;  %v1402_v5 = vmul.f32 0.6931472, %v2731_v62 }
 0x856   :  { %1892 = vst [vmem:[%s3687_s5 + $0x18] sm:$0xff] %v944_v2  ;;  %v1403_v11 = vadd.f32 %v1402_v5, %v1395_v9 }
 0x858   :  { %v1404_v13 = vsub.f32 %v3607_v34, %v1403_v11 }
 0x85a   :  { %1900 = vst [vmem:[%s3687_s5 + $0x28] sm:$0xff] %v1404_v13 }
 0x8d9   :  { %v1860_v32 = vpop.xlane.xlu1 %1859 }
 0x8da   :  { %2732 = vlog2.f32 %v1860_v32 }
 0x8e4   :  { %v2733_v52 = vpop.eup %2732 }
 0x8e5   :  { %v1862_v14 = vmul.f32 0.6931472, %v2733_v52 }
 0x8e7   :  { %v1863_v15 = vadd.f32 %v1862_v14, %v1855_v21 }
 0x8e9   :  { %v1864_v20 = vsub.f32 %v1851_v58, %v1863_v15 }
 0x8eb   :  { %1908 = vst [vmem:[%s3687_s5 + $0x38] sm:$0xff] %v1864_v20 }

</bundles_post_ra>
